<compile_context>
chip_gen: v6e
topology: v6e:2x2x1
jax: 0.10.0
libtpu: 0.0.40
codegen_flags: <defaults>
</compile_context>

<pallas_src>
import math

import jax
import jax.numpy as jnp
from jax.experimental import pallas as pl
from jax.experimental.pallas import tpu as pltpu

NEG_INF = -1e30   # finite large negative: exp() underflows to 0, never produces inf-inf NaNs


def _layernorm(v, g, b, eps):
    """LayerNorm with f32 statistics (inputs may be bf16 or f32)."""
    v32 = v.astype(jnp.float32)
    mu = jnp.mean(v32, axis=-1, keepdims=True)
    var = jnp.mean((v32 - mu) ** 2, axis=-1, keepdims=True)
    return (v32 - mu) * jax.lax.rsqrt(var + eps) * g + b


# -----------------------------------------------------------------------------
# Prologue kernel: shared-LayerNorm + K/V projections, once per token.
# grid = (batch, seq_tile)
# -----------------------------------------------------------------------------
def make_kv_kernel(eps: float):
    def kv_kernel(x_ref, lng_ref, lnb_ref, wk_ref, bk_ref, wv_ref, bv_ref,
                  k_out_ref, v_out_ref):
        h = _layernorm(x_ref[0], lng_ref[...], lnb_ref[...], eps).astype(jnp.bfloat16)
        k = jnp.dot(h, wk_ref[...], preferred_element_type=jnp.float32) + bk_ref[...]
        v = jnp.dot(h, wv_ref[...], preferred_element_type=jnp.float32) + bv_ref[...]
        k_out_ref[0] = k.astype(k_out_ref.dtype)
        v_out_ref[0] = v.astype(v_out_ref.dtype)
    return kv_kernel


# -----------------------------------------------------------------------------
# Main kernel: one grid step = one (batch, query-tile) pair.
# grid = (batch, n_query_tiles)
# -----------------------------------------------------------------------------
def make_attn_ffn_kernel(H: int, HD: int, TQ: int, eps: float):
    D = H * HD

    def kernel(x_ref, k_ref, v_ref,
               lng_ref, lnb_ref,
               wq_ref, bq_ref, wo_ref, bo_ref,
               w1_ref, b1_ref, lnffg_ref, lnffb_ref, w2_ref, b2_ref,
               o_ref):
        S = k_ref.shape[1]
        q_start = pl.program_id(1) * TQ
        g, b = lng_ref[...], lnb_ref[...]                          # [1, D] f32

        # ---- tile LayerNorm + full-lane Q projection (1/sqrt(HD) folded into Wq/bq) ----
        h_q = _layernorm(x_ref[0], g, b, eps)                      # [TQ, D] f32
        q2d = jnp.dot(h_q.astype(jnp.bfloat16), wq_ref[...],
                      preferred_element_type=jnp.float32) + bq_ref[...]     # [TQ, D] f32
        q2d = q2d.astype(jnp.bfloat16)

        kmat = k_ref[0]                                            # [S, HD] bf16 (shared head)
        vmat = v_ref[0]                                            # [S, HD] bf16 (shared head)

        # causal mask for this tile, hoisted out of the head loop
        rows = jax.lax.broadcasted_iota(jnp.int32, (TQ, S), 0) + q_start
        cols = jax.lax.broadcasted_iota(jnp.int32, (TQ, S), 1)
        causal = cols > rows                                       # [TQ, S] bool

        # ---- per-head attention (static loop; no broadcast of K/V, no padded Q proj) ----
        ctx_heads = []
        for head in range(H):
            qh = q2d[:, head * HD:(head + 1) * HD]                 # [TQ, HD] bf16 (static slice)
            sh = jnp.einsum("qd,kd->qk", qh, kmat,
                            preferred_element_type=jnp.float32)    # [TQ, S] f32 (MXU)
            sh = jnp.where(causal, NEG_INF, sh)
            mh = jnp.max(sh, axis=-1, keepdims=True)               # f32 row max
            eh = jnp.exp((sh - mh).astype(jnp.bfloat16))           # bf16 exp (EUP), f32 stats kept
            dh = jnp.sum(eh.astype(jnp.float32), axis=-1, keepdims=True)   # f32 denominator
            ch = jnp.dot(eh, vmat, preferred_element_type=jnp.float32)     # [TQ, HD] f32
            ch = ch / dh                                            # deferred, exact normalisation
            ctx_heads.append(ch.astype(jnp.bfloat16))

        # concat(ctx_heads) @ Wo : single K=D output-projection matmul (heads merged in lanes)
        ctx = ctx_heads[0] if H == 1 else jnp.concatenate(ctx_heads, axis=-1)   # [TQ, D]
        attn = jnp.dot(ctx, wo_ref[...],
                       preferred_element_type=jnp.float32) + bo_ref[...]        # [TQ, D] f32
        # NOTE: the original module computes `x + skip` and DISCARDS the result, so the
        # first residual is intentionally NOT added here.

        # ---- shared LayerNorm + FeedForward (Linear -> SiLU -> LayerNorm -> Linear) ----
        h2 = _layernorm(attn, g, b, eps).astype(jnp.bfloat16)
        y = jnp.dot(h2, w1_ref[...],
                    preferred_element_type=jnp.float32) + b1_ref[...]           # [TQ, INNER]
        y = y * jax.nn.sigmoid(y)                                                # SiLU (EUP)
        y = _layernorm(y, lnffg_ref[...], lnffb_ref[...], eps).astype(jnp.bfloat16)
        y = jnp.dot(y, w2_ref[...],
                    preferred_element_type=jnp.float32) + b2_ref[...]           # [TQ, D]
        # Dropout(p=0.0) is identity.

        o_ref[0] = (y + attn).astype(o_ref.dtype)                                # + skip_two

    return kernel


# -----------------------------------------------------------------------------
# Wrapper
# -----------------------------------------------------------------------------
def _const_spec(a):
    """Whole-array block with a grid-invariant index map (fetched once, never refetched)."""
    return pl.BlockSpec(a.shape, lambda *_, n=a.ndim: (0,) * n)


def transformer_block(x, params, heads, *, q_tile=256, kv_seq_tile=256, eps=1e-5):
    B, S, D = x.shape
    H = heads
    assert D % H == 0
    HD = D // H
    TQ = min(q_tile, S)
    TS = min(kv_seq_tile, S)
    assert S % TQ == 0 and S % TS == 0, "seq_len must be divisible by the tiles"
    n_q, n_s = S // TQ, S // TS
    scale = 1.0 / math.sqrt(HD)
    bf16, f32 = jnp.bfloat16, jnp.float32

    # Host-side weight prep: bf16 matmul weights, f32 biases / LN params, scale folded into Wq/bq.
    ln_g, ln_b = params["ln_g"].astype(f32), params["ln_b"].astype(f32)
    wq = (params["wq"] * scale).astype(bf16)
    bq = (params["bq"] * scale).astype(f32)
    wk, bk = params["wk"].astype(bf16), params["bk"].astype(f32)
    wv, bv = params["wv"].astype(bf16), params["bv"].astype(f32)
    wo, bo = params["wo"].astype(bf16), params["bo"].astype(f32)
    w1, b1 = params["w1"].astype(bf16), params["b1"].astype(f32)
    lnff_g, lnff_b = params["lnff_g"].astype(f32), params["lnff_b"].astype(f32)
    w2, b2 = params["w2"].astype(bf16), params["b2"].astype(f32)
    INNER = w1.shape[1]

    # ---- prologue: K / V of the single shared MQA head, computed once per token ----
    kv_inputs = [x, ln_g, ln_b, wk, bk, wv, bv]
    k_cache, v_cache = pl.pallas_call(
        make_kv_kernel(eps),
        out_shape=(jax.ShapeDtypeStruct((B, S, HD), bf16),
                   jax.ShapeDtypeStruct((B, S, HD), bf16)),
        grid=(B, n_s),
        in_specs=[pl.BlockSpec((1, TS, D), lambda bi, si: (bi, si, 0))]
                 + [_const_spec(a) for a in kv_inputs[1:]],
        out_specs=(pl.BlockSpec((1, TS, HD), lambda bi, si: (bi, si, 0)),
                   pl.BlockSpec((1, TS, HD), lambda bi, si: (bi, si, 0))),
        compiler_params=pltpu.CompilerParams(
            dimension_semantics=("parallel", "parallel")),
    )(*kv_inputs)

    # ---- main: attention + FFN, grid over (batch, query tile) ----
    weights = [ln_g, ln_b, wq, bq, wo, bo, w1, b1, lnff_g, lnff_b, w2, b2]

    flops = (2 * B * S * D * D            # Q projection
             + 4 * B * S * S * D          # scores + context (H heads x HD = D)
             + 2 * B * S * D * D          # output projection
             + 4 * B * S * D * INNER)     # feed-forward
    transcendentals = B * H * S * S + B * S * INNER
    bytes_accessed = int(2 * x.size * x.dtype.itemsize                 # x in, out
                         + (k_cache.size + v_cache.size) * 2           # bf16 K/V
                         + sum(w.size * w.dtype.itemsize for w in weights))
    cost = pl.CostEstimate(flops=int(flops), transcendentals=int(transcendentals),
                           bytes_accessed=bytes_accessed)

    out = pl.pallas_call(
        make_attn_ffn_kernel(H, HD, TQ, eps),
        out_shape=jax.ShapeDtypeStruct((B, S, D), x.dtype),
        grid=(B, n_q),
        in_specs=[pl.BlockSpec((1, TQ, D), lambda bi, qi: (bi, qi, 0)),   # x: tile-sized
                  pl.BlockSpec((1, S, HD), lambda bi, qi: (bi, 0, 0)),    # K: per batch
                  pl.BlockSpec((1, S, HD), lambda bi, qi: (bi, 0, 0))]    # V: per batch
                 + [_const_spec(a) for a in weights],
        out_specs=pl.BlockSpec((1, TQ, D), lambda bi, qi: (bi, qi, 0)),   # lane-dense output tile
        compiler_params=pltpu.CompilerParams(
            dimension_semantics=("parallel", "parallel"),
            vmem_limit_bytes=48 * 1024 * 1024,    # < 64 MiB physical VMEM on v7x
        ),
        cost_estimate=cost,
    )(x, k_cache, v_cache, *weights)
    return out


# -----------------------------------------------------------------------------
# Deterministic parameter init (shapes follow the PyTorch module's __init__;
# the fused Wqkv of MultiQueryAttention is stored as its q / k / v column blocks).
# -----------------------------------------------------------------------------
def init_params(key, D, heads, mult):
    HD = D // heads
    INNER = D * mult
    ks = jax.random.split(key, 12)
    f32 = jnp.float32
    n = lambda k, shape, s: s * jax.random.normal(k, shape, f32)
    return {
        # shared nn.LayerNorm(dim)
        "ln_g": jnp.ones((1, D), f32),
        "ln_b": jnp.zeros((1, D), f32),
        # MultiQueryAttention: Wqkv(dim -> dim + 2*head_dim) split into q/k/v, out_proj(dim->dim)
        "wq": n(ks[0], (D, D), 0.05),      "bq": n(ks[1], (1, D), 0.01),
        "wk": n(ks[2], (D, HD), 0.05),     "bk": n(ks[3], (1, HD), 0.01),
        "wv": n(ks[4], (D, HD), 0.05),     "bv": n(ks[5], (1, HD), 0.01),
        "wo": n(ks[6], (D, D), 0.05),      "bo": n(ks[7], (1, D), 0.01),
        # FeedForward: Linear(dim, dim*mult) -> SiLU -> LayerNorm(inner) -> Linear(inner, dim)
        "w1": n(ks[8], (D, INNER), 0.05),  "b1": n(ks[9], (1, INNER), 0.01),
        "lnff_g": jnp.ones((1, INNER), f32),
        "lnff_b": jnp.zeros((1, INNER), f32),
        "w2": n(ks[10], (INNER, D), 0.05), "b2": n(ks[11], (1, D), 0.01),
    }


# -----------------------------------------------------------------------------
# Pure-JAX f32 reference (mirrors the PyTorch forward) for the correctness check
# -----------------------------------------------------------------------------
def reference(x, p, heads, eps=1e-5):
    def ln(v, g, b):
        mu = v.mean(-1, keepdims=True)
        var = ((v - mu) ** 2).mean(-1, keepdims=True)
        return (v - mu) * jax.lax.rsqrt(var + eps) * g + b

    B, S, D = x.shape
    HD = D // heads
    h = ln(x, p["ln_g"], p["ln_b"])
    q = h @ p["wq"] + p["bq"]
    k = h @ p["wk"] + p["bk"]
    v = h @ p["wv"] + p["bv"]
    q = q.reshape(B, S, heads, HD).transpose(0, 2, 1, 3)                 # [B,H,S,HD]
    scores = jnp.einsum("bhsd,btd->bhst", q, k) * (1.0 / math.sqrt(HD))
    mask = jnp.triu(jnp.ones((S, S), bool), 1)
    scores = jnp.where(mask, NEG_INF, scores)
    pa = jax.nn.softmax(scores, axis=-1)
    ctx = jnp.einsum("bhst,btd->bhsd", pa, v).transpose(0, 2, 1, 3).reshape(B, S, D)
    attn = ctx @ p["wo"] + p["bo"]
    h2 = ln(attn, p["ln_g"], p["ln_b"])
    y = h2 @ p["w1"] + p["b1"]
    y = y * jax.nn.sigmoid(y)
    y = ln(y, p["lnff_g"], p["lnff_b"])
    y = y @ p["w2"] + p["b2"]
    return y + attn


if __name__ == "__main__":
    # Small but lane-dense shapes: D and head_dim multiples of 128, S a multiple of the
    # 256-row query tile (so the causal-offset logic is exercised across two tiles).
    B, S, D = 2, 512, 256
    heads, mult = 2, 4            # the module's dim_head arg is unused by MQA (it uses D // heads)

    key = jax.random.PRNGKey(0)
    kx, kp = jax.random.split(key)
    x = jax.random.normal(kx, (B, S, D), jnp.float32)
    params = init_params(kp, D, heads, mult)

    out = transformer_block(x, params, heads, q_tile=256, kv_seq_tile=256)
    out = jax.block_until_ready(out)

    ref = reference(x, params, heads)
    assert out.shape == (B, S, D)
    max_err = float(jnp.max(jnp.abs(out - ref)))
    # bf16 matmul operands / bf16 exp with f32 accumulation vs pure-f32 reference -> loose tolerance.
    assert jnp.allclose(out, ref, atol=5e-2, rtol=5e-2), f"mismatch vs reference (max|err|={max_err})"
    print("KERNEL_OK")
</pallas_src>

<mosaic_0001>
module attributes {stable_mosaic.version = 11 : i64} {
  func.func @kv_kernel(%arg0: i32, %arg1: i32, %arg2: memref<1x256x256xf32, #tpu.memory_space<vmem>>, %arg3: memref<1x256xf32, #tpu.memory_space<vmem>>, %arg4: memref<1x256xf32, #tpu.memory_space<vmem>>, %arg5: memref<256x128xbf16, #tpu.memory_space<vmem>>, %arg6: memref<1x128xf32, #tpu.memory_space<vmem>>, %arg7: memref<256x128xbf16, #tpu.memory_space<vmem>>, %arg8: memref<1x128xf32, #tpu.memory_space<vmem>>, %arg9: memref<1x256x128xbf16, #tpu.memory_space<vmem>>, %arg10: memref<1x256x128xbf16, #tpu.memory_space<vmem>>) attributes {dimension_semantics = [#tpu.dimension_semantics<parallel>, #tpu.dimension_semantics<parallel>], iteration_bounds = array<i64: 2, 2>, scalar_prefetch = 0 : i64, scratch_operands = 0 : i64, tpu.core_type = #tpu.core_type<tc>, window_params = [{transform_indices = @transform_0, window_bounds = array<i64: 1, 256, 256>}, {pipeline_mode = #tpu.pipeline_mode<synchronous>, transform_indices = @transform_1, window_bounds = array<i64: 1, 256>}, {pipeline_mode = #tpu.pipeline_mode<synchronous>, transform_indices = @transform_2, window_bounds = array<i64: 1, 256>}, {pipeline_mode = #tpu.pipeline_mode<synchronous>, transform_indices = @transform_3, window_bounds = array<i64: 256, 128>}, {pipeline_mode = #tpu.pipeline_mode<synchronous>, transform_indices = @transform_4, window_bounds = array<i64: 1, 128>}, {pipeline_mode = #tpu.pipeline_mode<synchronous>, transform_indices = @transform_5, window_bounds = array<i64: 256, 128>}, {pipeline_mode = #tpu.pipeline_mode<synchronous>, transform_indices = @transform_6, window_bounds = array<i64: 1, 128>}, {transform_indices = @transform_7, window_bounds = array<i64: 1, 256, 128>}, {transform_indices = @transform_8, window_bounds = array<i64: 1, 256, 128>}]} {
    %c0 = arith.constant 0 : index
    %c0_0 = arith.constant 0 : index
    %c0_1 = arith.constant 0 : index
    %0 = vector.load %arg2[%c0, %c0_0, %c0_1] : memref<1x256x256xf32, #tpu.memory_space<vmem>>, vector<1x256x256xf32>
    %1 = vector.shape_cast %0 : vector<1x256x256xf32> to vector<256x256xf32>
    %c0_2 = arith.constant 0 : index
    %c0_3 = arith.constant 0 : index
    %2 = vector.load %arg3[%c0_2, %c0_3] : memref<1x256xf32, #tpu.memory_space<vmem>>, vector<1x256xf32>
    %c0_4 = arith.constant 0 : index
    %c0_5 = arith.constant 0 : index
    %3 = vector.load %arg4[%c0_4, %c0_5] : memref<1x256xf32, #tpu.memory_space<vmem>>, vector<1x256xf32>
    %cst = arith.constant dense<0.000000e+00> : vector<256xf32>
    %4 = vector.multi_reduction <add>, %1, %cst [1] : vector<256x256xf32> to vector<256xf32>
    %5 = vector.shape_cast %4 : vector<256xf32> to vector<256x1xf32>
    %cst_6 = arith.constant 2.560000e+02 : f32
    %6 = vector.broadcast %cst_6 : f32 to vector<256x1xf32>
    %7 = arith.divf %5, %6 : vector<256x1xf32>
    %8 = vector.broadcast %7 : vector<256x1xf32> to vector<256x256xf32>
    %9 = arith.subf %1, %8 : vector<256x256xf32>
    %10 = arith.mulf %9, %9 : vector<256x256xf32>
    %cst_7 = arith.constant dense<0.000000e+00> : vector<256xf32>
    %11 = vector.multi_reduction <add>, %10, %cst_7 [1] : vector<256x256xf32> to vector<256xf32>
    %12 = vector.shape_cast %11 : vector<256xf32> to vector<256x1xf32>
    %cst_8 = arith.constant 2.560000e+02 : f32
    %13 = vector.broadcast %cst_8 : f32 to vector<256x1xf32>
    %14 = arith.divf %12, %13 : vector<256x1xf32>
    %15 = vector.broadcast %7 : vector<256x1xf32> to vector<256x256xf32>
    %16 = arith.subf %1, %15 : vector<256x256xf32>
    %cst_9 = arith.constant 9.99999974E-6 : f32
    %17 = vector.broadcast %cst_9 : f32 to vector<256x1xf32>
    %18 = arith.addf %14, %17 : vector<256x1xf32>
    %19 = math.rsqrt %18 : vector<256x1xf32>
    %20 = vector.broadcast %19 : vector<256x1xf32> to vector<256x256xf32>
    %21 = arith.mulf %16, %20 : vector<256x256xf32>
    %22 = vector.broadcast %2 : vector<1x256xf32> to vector<256x256xf32>
    %23 = arith.mulf %21, %22 : vector<256x256xf32>
    %24 = vector.broadcast %3 : vector<1x256xf32> to vector<256x256xf32>
    %25 = arith.addf %23, %24 : vector<256x256xf32>
    %26 = arith.truncf %25 : vector<256x256xf32> to vector<256x256xbf16>
    %c0_10 = arith.constant 0 : index
    %c0_11 = arith.constant 0 : index
    %27 = vector.load %arg5[%c0_10, %c0_11] : memref<256x128xbf16, #tpu.memory_space<vmem>>, vector<256x128xbf16>
    %cst_12 = arith.constant dense<0.000000e+00> : vector<256x128xf32>
    %28 = tpu.matmul %26, %27, %cst_12 {dimension_numbers = #tpu.dot_dimension_numbers<[1], [0], [0], [1], [0, 0, 1, 1], [], []>} : vector<256x256xbf16>, vector<256x128xbf16>, vector<256x128xf32> -> vector<256x128xf32>
    %c0_13 = arith.constant 0 : index
    %c0_14 = arith.constant 0 : index
    %29 = vector.load %arg6[%c0_13, %c0_14] : memref<1x128xf32, #tpu.memory_space<vmem>>, vector<1x128xf32>
    %30 = vector.broadcast %29 : vector<1x128xf32> to vector<256x128xf32>
    %31 = arith.addf %28, %30 : vector<256x128xf32>
    %c0_15 = arith.constant 0 : index
    %c0_16 = arith.constant 0 : index
    %32 = vector.load %arg7[%c0_15, %c0_16] : memref<256x128xbf16, #tpu.memory_space<vmem>>, vector<256x128xbf16>
    %cst_17 = arith.constant dense<0.000000e+00> : vector<256x128xf32>
    %33 = tpu.matmul %26, %32, %cst_17 {dimension_numbers = #tpu.dot_dimension_numbers<[1], [0], [0], [1], [0, 0, 1, 1], [], []>} : vector<256x256xbf16>, vector<256x128xbf16>, vector<256x128xf32> -> vector<256x128xf32>
    %c0_18 = arith.constant 0 : index
    %c0_19 = arith.constant 0 : index
    %34 = vector.load %arg8[%c0_18, %c0_19] : memref<1x128xf32, #tpu.memory_space<vmem>>, vector<1x128xf32>
    %35 = vector.broadcast %34 : vector<1x128xf32> to vector<256x128xf32>
    %36 = arith.addf %33, %35 : vector<256x128xf32>
    %37 = arith.truncf %31 : vector<256x128xf32> to vector<256x128xbf16>
    %c0_20 = arith.constant 0 : index
    %c0_21 = arith.constant 0 : index
    %c0_22 = arith.constant 0 : index
    %38 = vector.load %arg9[%c0_20, %c0_21, %c0_22] : memref<1x256x128xbf16, #tpu.memory_space<vmem>>, vector<1x256x128xbf16>
    %39 = vector.shape_cast %38 : vector<1x256x128xbf16> to vector<256x128xbf16>
    %40 = vector.shape_cast %37 : vector<256x128xbf16> to vector<1x256x128xbf16>
    tpu.vector_store %arg9[%c0_20, %c0_21, %c0_22], %40 {strides = array<i32>} : memref<1x256x128xbf16, #tpu.memory_space<vmem>>, vector<1x256x128xbf16>,
    %41 = arith.truncf %36 : vector<256x128xf32> to vector<256x128xbf16>
    %c0_23 = arith.constant 0 : index
    %c0_24 = arith.constant 0 : index
    %c0_25 = arith.constant 0 : index
    %42 = vector.load %arg10[%c0_23, %c0_24, %c0_25] : memref<1x256x128xbf16, #tpu.memory_space<vmem>>, vector<1x256x128xbf16>
    %43 = vector.shape_cast %42 : vector<1x256x128xbf16> to vector<256x128xbf16>
    %44 = vector.shape_cast %41 : vector<256x128xbf16> to vector<1x256x128xbf16>
    tpu.vector_store %arg10[%c0_23, %c0_24, %c0_25], %44 {strides = array<i32>} : memref<1x256x128xbf16, #tpu.memory_space<vmem>>, vector<1x256x128xbf16>,
    return
  }
  func.func @transform_0(%arg0: i32, %arg1: i32) -> (i32, i32, i32) {
    %c0_i32 = arith.constant 0 : i32
    %c0_i32_0 = arith.constant 0 : i32
    return %arg0, %arg1, %c0_i32 : i32, i32, i32
  }
  func.func @transform_1(%arg0: i32, %arg1: i32) -> (i32, i32) {
    %c0_i32 = arith.constant 0 : i32
    %c0_i32_0 = arith.constant 0 : i32
    %c0_i32_1 = arith.constant 0 : i32
    return %c0_i32, %c0_i32_0 : i32, i32
  }
  func.func @transform_2(%arg0: i32, %arg1: i32) -> (i32, i32) {
    %c0_i32 = arith.constant 0 : i32
    %c0_i32_0 = arith.constant 0 : i32
    %c0_i32_1 = arith.constant 0 : i32
    return %c0_i32, %c0_i32_0 : i32, i32
  }
  func.func @transform_3(%arg0: i32, %arg1: i32) -> (i32, i32) {
    %c0_i32 = arith.constant 0 : i32
    %c0_i32_0 = arith.constant 0 : i32
    %c0_i32_1 = arith.constant 0 : i32
    return %c0_i32, %c0_i32_0 : i32, i32
  }
  func.func @transform_4(%arg0: i32, %arg1: i32) -> (i32, i32) {
    %c0_i32 = arith.constant 0 : i32
    %c0_i32_0 = arith.constant 0 : i32
    %c0_i32_1 = arith.constant 0 : i32
    return %c0_i32, %c0_i32_0 : i32, i32
  }
  func.func @transform_5(%arg0: i32, %arg1: i32) -> (i32, i32) {
    %c0_i32 = arith.constant 0 : i32
    %c0_i32_0 = arith.constant 0 : i32
    %c0_i32_1 = arith.constant 0 : i32
    return %c0_i32, %c0_i32_0 : i32, i32
  }
  func.func @transform_6(%arg0: i32, %arg1: i32) -> (i32, i32) {
    %c0_i32 = arith.constant 0 : i32
    %c0_i32_0 = arith.constant 0 : i32
    %c0_i32_1 = arith.constant 0 : i32
    return %c0_i32, %c0_i32_0 : i32, i32
  }
  func.func @transform_7(%arg0: i32, %arg1: i32) -> (i32, i32, i32) {
    %c0_i32 = arith.constant 0 : i32
    %c0_i32_0 = arith.constant 0 : i32
    return %arg0, %arg1, %c0_i32 : i32, i32, i32
  }
  func.func @transform_8(%arg0: i32, %arg1: i32) -> (i32, i32, i32) {
    %c0_i32 = arith.constant 0 : i32
    %c0_i32_0 = arith.constant 0 : i32
    return %arg0, %arg1, %c0_i32 : i32, i32, i32
  }
}

</mosaic_0001>

<bundles_post_ra>
// kernel: tpu_custom_call.1
= control target key start
LH: loop header
LB: loop body
LE: loop exit
PB: predicated region body
PF: predicated region fallthrough
CT: control target
= control target key end

     0   :  { %s4545_s0 = inlined_call_operand.hbm [shape: f32[2,512,256], index: 0, kind: input, shape index: {}]   ;;  %s4546_s1 = inlined_call_operand.hbm [shape: f32[1,256], index: 1, kind: input, shape index: {}]   ;;  %s4547_s2 = inlined_call_operand.vmem [shape: f32[1,256], index: 2, kind: input, shape index: {}]   ;;  %s4548_s3 = inlined_call_operand.hbm [shape: bf16[256,128], index: 3, kind: input, shape index: {}]   ;;  %s4549_s4 = inlined_call_operand.vmem [shape: f32[1,128], index: 4, kind: input, shape index: {}]   ;;  %s4550_s5 = inlined_call_operand.hbm [shape: bf16[256,128], index: 5, kind: input, shape index: {}]   ;;  %s4551_s6 = inlined_call_operand.vmem [shape: f32[1,128], index: 6, kind: input, shape index: {}]   ;;  %s4552_s7 = inlined_call_operand.hbm [shape: bf16[2,512,128], index: 7, kind: output, shape index: {0}]   ;;  %s4553_s8 = inlined_call_operand.hbm [shape: bf16[2,512,128], index: 8, kind: output, shape index: {1}]  }
   0x1   :  { %4590 = sst [smem:[#allocation45_spill]] %s4546_s1 }
   0x2   :  { %4591 = sst [smem:[#allocation46_spill]] %s4548_s3 }
   0x3   :  { %4592 = sst [smem:[#allocation47_spill]] %s4550_s5 }
   0x4   :  { %4593 = sst [smem:[#allocation48_spill]] %s4552_s7 }
   0x5   :  { %4594 = sst [smem:[#allocation49_spill]] %s4553_s8 }
   0x6   :  { %14 = vsyncpa [#allocation3], 0 }
   0x7   :  { %16 = vsyncpa [#allocation3 + $0x1], 0 }
   0x8   :  { %17 = vsyncpa [#allocation6], 0 }
   0x9   :  { %18 = vsyncpa [#allocation9], 0 }
   0xa   :  { %19 = vsyncpa [#allocation4], 0 }
   0xb   :  { %21 = vsyncpa [#allocation4 + $0x1], 0 }
   0xc   :  { %22 = vsyncpa [#allocation12], 0 }
   0xd   :  { %24 = vsyncpa [#allocation12 + $0x1], 0  ;;  %s3389_s27 = smov 0   ;;  %s3391_s28 = smov 0  }
   0xe   :  { %s3393_s29 = smov 0   ;;  %s3395_s30 = smov 0  }
   0xf   :  { %s3397_s9 = smov 0   ;;  %s3399_s10 = smov 0  }
  0x10   :  { %s3401_s11 = smov 0   ;;  %s3403_s12 = smov 0  }
  0x11 LB: > { %4595 = sst [smem:[#allocation18_spill]] %s3302_s27  ;;  %s2268_s13 = sadd.s32 4294967295, %s3330_s12   ;;  %s3330_s12 = sphi %s3403_s12, %s30_s12   ;;  %s3326_s11 = sphi %s3401_s11, %s4676_s11   ;;  %s3322_s10 = sphi %s3399_s10, %s4671_s10   ;;  %s3318_s9 = sphi %s3397_s9, %s4675_s9   ;;  %s3314_s30 = sphi %s3395_s30, %s4670_s30   ;;  %s3310_s29 = sphi %s3393_s29, %s4674_s29   ;;  %s3306_s28 = sphi %s3391_s28, %s4673_s28   ;;  %s3302_s27 = sphi %s3389_s27, %s4672_s27  }
  0x12   : > { %4596 = sst [smem:[#allocation19_spill]] %s3322_s10  ;;  %s2269_s14 = sadd.s32 4294967294, %s3330_s12  }
  0x13   : > { %p64_p0 = scmp.ne.s32.totalorder %s3306_s28, %s3302_s27  ;;  %p3433_p1 = scmp.eq.s32.totalorder %s2268_s13, 0 }
  0x14   : > { %p3437_p2 = scmp.eq.s32.totalorder %s2268_s13, 3  ;;  %p222_p3 = scmp.eq.s32.totalorder %s2269_s14, 3 }
  0x15   : > { %s4597_s15 = scalar_select %p3433_p1, 1, 0 }
  0x16   : > { %s4598_s16 = scalar_select %p3437_p2, 1, 0 }
  0x17   : > { %p3443_p4 = por %p3433_p1, %p64_p0  ;;  %p2270_p5 = scmp.ge.s32.totalorder %s3330_s12, 1 }
  0x18   : > { %p3448_p6 = por %p222_p3, %p64_p0  ;;  %p257_p7 = scmp.lt.s32.totalorder %s3330_s12, 5 }
  0x19   : > { %s4599_s17 = scalar_select %p3443_p4, 1, 0 }
  0x1a   : > { %s4600_s18 = scalar_select %p3448_p6, 1, 0 }
  0x1b   : > { %p3453_p8 = pnand %p2270_p5, %p257_p7  ;;  %s3332_s20 = smov [#allocation5]  }
  0x1c   : > { %4601 = sst [smem:[#allocation20_spill]] %s4600_s18  ;;  %s270_s21 = sshll.u32 %s3332_s20, 4  ;;  %s271_s21 = int_to_ptr.vmem [resolvable:$true] %s270_s21 }
  0x1d   : > { %s4602_s19 = scalar_select %p3453_p8, 1, 0 }
  0x1e   : > { %p2892_p9 = pneg %p3453_p8  ;;  %s3333_s22 = smov [#allocation7]  }
  0x1f   : > { %s283_s23 = sshll.u32 %s3333_s22, 4  ;;  %s3334_s25 = smov [#allocation8]   ;;  %s284_s23 = int_to_ptr.vmem [resolvable:$true] %s283_s23 }
  0x20   : > { %p3461_p10 = pnand %p2892_p9, %p3433_p1  ;;  %s299_s26 = sshll.u32 %s3334_s25, 4  ;;  %s300_s26 = int_to_ptr.vmem [resolvable:$true] %s299_s26 }
  0x21   : > { %s3101_s13 = scalar_lea.vmem %s271_s21, 32  ;;  %p3109_p3 = scmp.lt.s32.totalorder %s271_s21, %s271_s21 }
  0x22   : > { %p3092_p11 = pneg %p3461_p10  ;;  %p3102_p12 = scmp.ne.s32.totalorder %s271_s21, %s3101_s13 }
  0x23   : > { %p3110_p5 = scmp.lt.s32.totalorder %s3101_s13, %s3101_s13 }
  0x24   : > { %p3104_p13 = pnand %p3102_p12, %p3092_p11 }
  0x25   : > { %p3111_p7 = por %p3110_p5, %p3109_p3 }
  0x26   : > { %p3105_p0 = pneg %p3104_p13 }
  0x28   : > { %p3112_p9 = pnand %p3111_p7, %p3105_p0 }
  0x2a   : > { %3115 = shalt.err (!%p3112_p9)
}
  0x2b   : > { %s4604_s1 = sld [smem:[#allocation45_spill]]  ;;  %s3127_s22 = scalar_lea.vmem %s284_s23, 2048 }
  0x2c   : > { %p3128_p6 = scmp.ne.s32.totalorder %s284_s23, %s3127_s22  ;;  %p3135_p12 = scmp.lt.s32.totalorder %s284_s23, %s284_s23 }
  0x2d   : > { %p3136_p13 = scmp.lt.s32.totalorder %s3127_s22, %s3127_s22 }
  0x2e   : > { %p3130_p1 = pnand %p3128_p6, %p3092_p11 }
  0x2f   : > { %p3137_p8 = por %p3136_p13, %p3135_p12 }
  0x30   : > { %p3131_p4 = pneg %p3130_p1 }
  0x31   : > { %2895 = dma.hbm_to_vmem [thread:$0]  (!%p3461_p10), %s4604_s1, 32, %s271_s21, [#allocation6]  }
  0x32   : > { %p3138_p2 = pnand %p3137_p8, %p3131_p4 }
  0x34   : > { %3141 = shalt.err (!%p3138_p2)
}
  0x35   : > { %s3335_s25 = smov 64   ;;  %s3336_s13 = smov 4  }
  0x36   : > { %s4605_s3 = sld [smem:[#allocation46_spill]]  ;;  %s3153_s21 = scalar_lea.vmem %s300_s26, 2048 }
  0x37   : > { %p3154_p0 = scmp.ne.s32.totalorder %s300_s26, %s3153_s21  ;;  %p3161_p3 = scmp.lt.s32.totalorder %s300_s26, %s300_s26 }
  0x38   : > { %p3162_p5 = scmp.lt.s32.totalorder %s3153_s21, %s3153_s21 }
  0x39   : > { %p3156_p1 = pnand %p3154_p0, %p3092_p11 }
  0x3a   : > { %p3163_p4 = por %p3162_p5, %p3161_p3 }
  0x3b   : > { %p3157_p6 = pneg %p3156_p1 }
  0x3c   : > { %2898 = dma.hbm_to_vmem [thread:$0]  (!%p3461_p10), %s4605_s3, 2048, %s284_s23, [#allocation6], %s3335_s25, %s3335_s25, %s3336_s13  }
  0x3d   : > { %p3164_p2 = pnand %p3163_p4, %p3157_p6 }
  0x3f   : > { %3167 = shalt.err (!%p3164_p2)
}
  0x40   : > { %s4606_s5 = sld [smem:[#allocation47_spill]]  ;;  %s39_s18 = sadd.s32 1, %s3322_s10 }
  0x41   : > { %p40_p8 = scmp.ge.s32.totalorder %s39_s18, 2  ;;  %s42_s23 = sadd.s32 1, %s3326_s11 }
  0x42   : > { %s51_s24 = sadd.s32 1, %s3310_s29  ;;  %p58_p11 = scmp.ne.s32.totalorder %s3310_s29, %s3306_s28 }
  0x43   : > { %s4678_s18 = smov (%p40_p8, %s39_s18), 0  ;;  %s4680_s23 = smov (!%p40_p8, %s42_s23), %s3326_s11 }
  0x44   : > { %4607 = sst [smem:[#allocation21_spill]] %s4678_s18  ;;  %s47_s14 = ssub.s32 %s3322_s10, %s4678_s18 }
  0x45   : > { %p59_p7 = scmp.eq.s32.totalorder %s3330_s12, 0  ;;  %p44_p9 = scmp.ge.s32.totalorder %s4680_s23, 2 }
  0x46   : > { %2901 = dma.hbm_to_vmem [thread:$0]  (!%p3461_p10), %s4606_s5, 2048, %s300_s26, [#allocation9], %s3335_s25, %s3335_s25, %s3336_s13  }
  0x47   : > { %p4608_p12 = scmp.ne.s32.totalorder %s4598_s16, 0  ;;  %p3508_p10 = por %p59_p7, %p58_p11 }
  0x48   : > { %p2916_p0 = scmp.lt.s32.totalorder %s3330_s12, 4  ;;  %s4682_s23 = smov (%p44_p9, %s4680_s23), 0 }
  0x49   : > { %p3504_p13 = por %p4608_p12, %p58_p11  ;;  %s316_s25 = sand.u32 1, %s3310_s29  }
  0x4a   : > { %s2395_s13 = sshll.u32 %s3322_s10, 6  ;;  %s46_s20 = ssub.s32 %s3326_s11, %s4682_s23 }
  0x4b   : > { %s4609_s21 = scalar_select %p3504_p13, 1, 0 }
  0x4c   : > { %s48_s22 = sor.u32 %s47_s14, %s46_s20  ;;  %s2275_s1 = sshll.u32 %s316_s25, 9 }
  0x4d   : > { %4610 = sst [smem:[#allocation22_spill]] %s4609_s21  ;;  %p49_p1 = scmp.eq.s32.totalorder %s48_s22, 0 }
  0x4e   : > { %s2278_s16 = sshll.u32 %s3326_s11, 7  ;;  %s320_s3 = scalar_lea.vmem [#allocation2], %s2275_s1 }
  0x4f   : > { %s330_s5 = sshll.u32 %s320_s3, 4  ;;  %s327_s27 = sadd.s32 %s2395_s13, %s2278_s16  ;;  %s331_s5 = int_to_ptr.vmem [resolvable:$true] %s330_s5 }
  0x50   : > { %s3521_s18 = scalar_select %p49_p1, %s3310_s29, %s51_s24  }
  0x51   : > { %s2279_s8 = sshll.u32 %s327_s27, 7  ;;  %p3527_p6 = pnand %p2916_p0, %p3508_p10 }
  0x52   : > { %s329_s14 = scalar_lea.hbm %s4545_s0, %s2279_s8  ;;  %s317_s20 = scalar_lea.sflag [#allocation3], %s316_s25 }
  0x53   : > { %p3170_p3 = pneg %p3527_p6  ;;  %s3181_s1 = scalar_lea.vmem %s331_s5, 8192 }
  0x54   : > { %p3182_p5 = scmp.ne.s32.totalorder %s331_s5, %s3181_s1  ;;  %s3337_s3 = smov [#allocation2]  }
  0x55   : > { %s3186_s27 = sshll.u32 %s3337_s3, 4  ;;  %s3187_s27 = int_to_ptr.vmem [resolvable:$false] %s3186_s27 }
  0x56   : > { %p3184_p4 = pnand %p3182_p5, %p3170_p3  ;;  %s3188_s24 = scalar_lea.vmem %s3187_s27, 16384 }
  0x57   : > { %p3189_p8 = scmp.lt.s32.totalorder %s331_s5, %s3187_s27  ;;  %p3190_p11 = scmp.lt.s32.totalorder %s3188_s24, %s3181_s1 }
  0x58   : > { %p3185_p2 = pneg %p3184_p4 }
  0x59   : > { %p3191_p7 = por %p3190_p11, %p3189_p8 }
  0x5b   : > { %p3192_p9 = pnand %p3191_p7, %p3185_p2 }
  0x5d   : > { %3195 = shalt.err (!%p3192_p9)
}
  0x5e   : > { %s3338_s26 = smov 256   ;;  %s3339_s10 = smov 16  }
  0x5f   : > { %2905 = dma.hbm_to_vmem [thread:$0]  (!%p3527_p6), %s329_s14, 8192, %s331_s5, %s317_s20, %s3338_s26, %s3338_s26, %s3339_s10  }
  0x60   : > { %p4613_p12 = scmp.ne.s32.totalorder %s4602_s19, 0 }
  0x62   : > { %342 = sbr.rel (%p4613_p12) target bundleno = 862 (0x35e), region = 48 }
  0x67   : > { %s3541_s8 = sand.u32 1, %s3306_s28   ;;  %p4614_p10 = scmp.ne.s32.totalorder %s4599_s17, 0 }
  0x68   : > { %s2281_s21 = sshll.u32 %s3541_s8, 9  ;;  %s345_s25 = scalar_lea.sflag [#allocation3], %s3541_s8 }
  0x69   : > { %s3545_s13 = scalar_lea.vmem [#allocation2], %s2281_s21 }
  0x6a   : > { %3281 = dma.done.wait (%p4614_p10), %s345_s25, 8192  }
  0x6b   : > { %3283 = vsyncadd (%p4614_p10), %s345_s25, 4294959104  ;;  %p4615_p0 = scmp.ne.s32.totalorder %s4597_s15, 0 }
  0x6d   : > { %3285 = dma.done.wait (%p4615_p0), [#allocation6], 2080  }
  0x6e   : > { %3287 = vsyncadd (%p4615_p0), [#allocation6], 4294965216 }
  0x6f   : > { %3289 = dma.done.wait (%p4615_p0), [#allocation9], 2048  }
  0x70   : > { %3291 = vsyncadd (%p4615_p0), [#allocation9], 4294965248  ;;  %v3560_v0 = vld [vmem:[%s3545_s13] sm:$0xff]  ;;  %v3563_v1 = vld [vmem:[%s3545_s13 + $0x8] sm:$0xff]  ;;  %s2285_s16 = sshll.u32 %s3541_s8, 7  ;;  %s2387_s1 = sshll.u32 %s3314_s30, 5 }
  0x71   : > { %v3566_v2 = vld [vmem:[%s3545_s13 + $0x10] sm:$0xff]  ;;  %v468_v3 = vadd.f32 %v3563_v1, %v3560_v0  ;;  %v3571_v4 = vld [vmem:[%s3545_s13 + $0x18] sm:$0xff]  ;;  %v3574_v5 = vld [vmem:[%s3545_s13 + $0x20] sm:$0xff]  ;;  %s4353_s14 = scalar_lea.vmem [#allocation10], %s2285_s16  ;;  %s4356_s20 = scalar_lea.vmem [#allocation11], %s2285_s16 }
  0x72   : > { %v3577_v6 = vld [vmem:[%s3545_s13 + $0x28] sm:$0xff]  ;;  %v3582_v8 = vld [vmem:[%s3545_s13 + $0x30] sm:$0xff]  ;;  %v3585_v9 = vld [vmem:[%s3545_s13 + $0x38] sm:$0xff]  ;;  %v471_v10 = vadd.f32 %v3571_v4, %v3566_v2  ;;  %s2388_s3 = sshll.u32 %s3318_s9, 6  ;;  %s2096_s24 = sshll.u32 %s4353_s14, 4  ;;  %s4450_s24 = int_to_ptr.vmem [resolvable:$true] %s2096_s24 }
  0x73   : > { %v474_v7 = vadd.f32 %v3577_v6, %v3574_v5  ;;  %469 = vadd.xlane.f32.xlu0 %v468_v3  ;;  %v477_v11 = vadd.f32 %v3585_v9, %v3582_v8  ;;  %v3592_v12 = vld [vmem:[%s3545_s13 + $0x40] sm:$0xff]  ;;  %v3595_v13 = vld [vmem:[%s3545_s13 + $0x48] sm:$0xff]  ;;  %v3598_v14 = vld [vmem:[%s3545_s13 + $0x50] sm:$0xff]  ;;  %s2093_s27 = sadd.s32 %s2388_s3, %s2387_s1  ;;  %s2114_s26 = sshll.u32 %s4356_s20, 4  ;;  %s4463_s26 = int_to_ptr.vmem [resolvable:$true] %s2114_s26 }
  0x74   : > { %v3601_v15 = vld [vmem:[%s3545_s13 + $0x58] sm:$0xff]  ;;  %v480_v16 = vadd.f32 %v3595_v13, %v3592_v12  ;;  %v3608_v18 = vld [vmem:[%s3545_s13 + $0x60] sm:$0xff]  ;;  %v3611_v19 = vld [vmem:[%s3545_s13 + $0x68] sm:$0xff]  ;;  %s2389_s30 = sshll.u32 %s2093_s27, 6  ;;  %s4665_s25 = sld [smem:[#allocation48_spill]] }
  0x75   : > { %475 = vadd.xlane.f32.xlu1 %v474_v7  ;;  %v483_v17 = vadd.f32 %v3601_v15, %v3598_v14  ;;  %v3614_v20 = vld [vmem:[%s3545_s13 + $0x70] sm:$0xff]  ;;  %v3617_v21 = vld [vmem:[%s3545_s13 + $0x78] sm:$0xff]  ;;  %v486_v22 = vadd.f32 %v3611_v19, %v3608_v18  ;;  %v3624_v24 = vld [vmem:[%s3545_s13 + $0x80] sm:$0xff]  ;;  %s4666_s15 = sld [smem:[#allocation49_spill]]  ;;  %s2076_s19 = scalar_lea.sflag [#allocation4], %s3541_s8 }
  0x76   : > { %v489_v23 = vadd.f32 %v3617_v21, %v3614_v20  ;;  %v3627_v25 = vld [vmem:[%s3545_s13 + $0x88] sm:$0xff]  ;;  %v3630_v26 = vld [vmem:[%s3545_s13 + $0x90] sm:$0xff]  ;;  %v3633_v27 = vld [vmem:[%s3545_s13 + $0x98] sm:$0xff]  ;;  %s3196_s22 = scalar_lea.vmem %s4450_s24, 2048  ;;  %s3340_s16 = smov [#allocation10]  }
  0x77   : > { %472 = vadd.xlane.f32.xlu0 %v471_v10  ;;  %v3636_v28 = vld [vmem:[%s3545_s13 + $0xa0] sm:$0xff]  ;;  %v3639_v29 = vld [vmem:[%s3545_s13 + $0xa8] sm:$0xff]  ;;  %v492_v30 = vadd.f32 %v3627_v25, %v3624_v24  ;;  %v3644_v31 = vld [vmem:[%s3545_s13 + $0xb0] sm:$0xff]  ;;  %v495_v33 = vadd.f32 %v3633_v27, %v3630_v26  ;;  %p3197_p1 = scmp.ne.s32.totalorder %s4450_s24, %s3196_s22  ;;  %s3200_s1 = sshll.u32 %s3340_s16, 4  ;;  %s3201_s1 = int_to_ptr.vmem [resolvable:$false] %s3200_s1 }
  0x78   : > { %v3647_v32 = vld [vmem:[%s3545_s13 + $0xb8] sm:$0xff]  ;;  %v3652_v34 = vld [vmem:[%s3545_s13 + $0xc0] sm:$0xff]  ;;  %v3655_v35 = vld [vmem:[%s3545_s13 + $0xc8] sm:$0xff]  ;;  %v498_v36 = vadd.f32 %v3639_v29, %v3636_v28  ;;  %s3202_s3 = scalar_lea.vmem %s3201_s1, 4096  ;;  %p3203_p5 = scmp.lt.s32.totalorder %s4450_s24, %s3201_s1 }
  0x79   : > { %478 = vadd.xlane.f32.xlu1 %v477_v11  ;;  %v501_v37 = vadd.f32 %v3647_v32, %v3644_v31  ;;  %v3662_v38 = vld [vmem:[%s3545_s13 + $0xd0] sm:$0xff]  ;;  %v3665_v39 = vld [vmem:[%s3545_s13 + $0xd8] sm:$0xff]  ;;  %v3668_v40 = vld [vmem:[%s3545_s13 + $0xe0] sm:$0xff]  ;;  %v504_v42 = vadd.f32 %v3655_v35, %v3652_v34  ;;  %p3198_p6 = pnand %p3197_p1, %p3504_p13  ;;  %p3204_p4 = scmp.lt.s32.totalorder %s3202_s3, %s3196_s22 }
  0x7a   : > { %v3671_v41 = vld [vmem:[%s3545_s13 + $0xe8] sm:$0xff]  ;;  %v3676_v43 = vld [vmem:[%s3545_s13 + $0xf0] sm:$0xff]  ;;  %v3679_v44 = vld [vmem:[%s3545_s13 + $0xf8] sm:$0xff]  ;;  %v507_v45 = vadd.f32 %v3665_v39, %v3662_v38 }
  0x7b   : > { %481 = vadd.xlane.f32.xlu0 %v480_v16  ;;  %v3684_v46 = vld [vmem:[%s3545_s13 + $0x100] sm:$0xff]  ;;  %v3687_v47 = vld [vmem:[%s3545_s13 + $0x108] sm:$0xff]  ;;  %v510_v48 = vadd.f32 %v3671_v41, %v3668_v40  ;;  %v513_v49 = vadd.f32 %v3679_v44, %v3676_v43  ;;  %v3694_v50 = vld [vmem:[%s3545_s13 + $0x110] sm:$0xff]  ;;  %s4461_s17 = scalar_lea.hbm %s4666_s15, %s2389_s30  ;;  %p3199_p3 = pneg %p3198_p6 }
  0x7c   : > { %v3697_v51 = vld [vmem:[%s3545_s13 + $0x118] sm:$0xff]  ;;  %v3700_v52 = vld [vmem:[%s3545_s13 + $0x120] sm:$0xff]  ;;  %v3703_v53 = vld [vmem:[%s3545_s13 + $0x128] sm:$0xff]  ;;  %v516_v54 = vadd.f32 %v3687_v47, %v3684_v46  ;;  %p3205_p2 = por %p3204_p4, %p3203_p5 }
  0x7d   : > { %484 = vadd.xlane.f32.xlu1 %v483_v17  ;;  %v519_v55 = vadd.f32 %v3697_v51, %v3694_v50  ;;  %v3710_v56 = vld [vmem:[%s3545_s13 + $0x130] sm:$0xff]  ;;  %v3713_v57 = vld [vmem:[%s3545_s13 + $0x138] sm:$0xff]  ;;  %v522_v58 = vadd.f32 %v3703_v53, %v3700_v52 }
  0x7e   : > { %v525_v59 = vadd.f32 %v3713_v57, %v3710_v56  ;;  %v2994_v60 = vld [vmem:[#allocation7 + $0x78] sm:$0xff]   ;;  %p3206_p8 = pnand %p3205_p2, %p3199_p3 }
  0x7f   : > { %487 = vadd.xlane.f32.xlu0 %v486_v22  ;;  %v2995_v61 = vld [vmem:[#allocation8 + $0x78] sm:$0xff]   ;;  %2650 = vmatprep.subr.bf16.mxu0 %v2994_v60 }
  0x80   : > { %2762 = vmatprep.subr.bf16.mxu1 %v2995_v61  ;;  %v3767_v60 = vld [vmem:[%s3545_s13 + $0x158] sm:$0xff] }
  0x81   : > { %490 = vadd.xlane.f32.xlu1 %v489_v23 }
  0x83   : > { %493 = vadd.xlane.f32.xlu0 %v492_v30 }
  0x85   : > { %496 = vadd.xlane.f32.xlu1 %v495_v33 }
  0x87   : > { %499 = vadd.xlane.f32.xlu0 %v498_v36 }
  0x89   : > { %502 = vadd.xlane.f32.xlu1 %v501_v37 }
  0x8b   : > { %505 = vadd.xlane.f32.xlu0 %v504_v42 }
  0x8d   : > { %508 = vadd.xlane.f32.xlu1 %v507_v45 }
  0x8f   : > { %511 = vadd.xlane.f32.xlu0 %v510_v48 }
  0x91   : > { %514 = vadd.xlane.f32.xlu1 %v513_v49 }
  0x93   : > { %517 = vadd.xlane.f32.xlu0 %v516_v54 }
  0x95   : > { %520 = vadd.xlane.f32.xlu1 %v519_v55 }
  0x97   : > { %523 = vadd.xlane.f32.xlu0 %v522_v58 }
  0x99   : > { %526 = vadd.xlane.f32.xlu1 %v525_v59  ;;  %v3764_v59 = vld [vmem:[%s3545_s13 + $0x150] sm:$0xff] }
  0xfc   : > { %v470_v62 = vpop.xlane.xlu0 %469 }
  0xfd   : > { %v565_v63 = vmul.f32 0.00390625, %v470_v62 }
  0xfe   : > { %v476_v3 = vpop.xlane.xlu1 %475 }
  0xff   : > { %v567_v7 = vmul.f32 0.00390625, %v476_v3  ;;  %v3720_v10 = vsub.f32 %v3560_v0, %v565_v63  ;;  %v3723_v11 = vsub.f32 %v3563_v1, %v565_v63  ;;  %v3736_v0 = vld [vmem:[%s3545_s13 + $0x140] sm:$0xff]  ;;  %v3739_v1 = vld [vmem:[%s3545_s13 + $0x148] sm:$0xff] }
 0x100   : > { %v473_v16 = vpop.xlane.xlu0 %472  ;;  %v528_v48 = vadd.f32 %v3739_v1, %v3736_v0 }
 0x101   : > { %v3726_v17 = vsub.f32 %v3574_v5, %v567_v7  ;;  %v3729_v22 = vsub.f32 %v3577_v6, %v567_v7  ;;  %v566_v23 = vmul.f32 0.00390625, %v473_v16  ;;  %v661_v30 = vmul.f32 %v3720_v10, %v3720_v10 }
 0x102   : > { %v662_v33 = vmul.f32 %v3723_v11, %v3723_v11  ;;  %v479_v36 = vpop.xlane.xlu1 %478 }
 0x103   : > { %v568_v37 = vmul.f32 0.00390625, %v479_v36  ;;  %v3742_v5 = vsub.f32 %v3566_v2, %v566_v23  ;;  %v3745_v6 = vsub.f32 %v3571_v4, %v566_v23  ;;  %v665_v54 = vmul.f32 %v3726_v17, %v3726_v17 }
 0x104   : > { %v725_v42 = vadd.f32 %v662_v33, %v661_v30  ;;  %v482_v49 = vpop.xlane.xlu0 %481  ;;  %v666_v55 = vmul.f32 %v3729_v22, %v3729_v22  ;;  %v3780_v30 = vld [vmem:[%s3545_s13 + $0x160] sm:$0xff]  ;;  %v3783_v33 = vld [vmem:[%s3545_s13 + $0x168] sm:$0xff] }
 0x105   : > { %v3748_v45 = vsub.f32 %v3582_v8, %v568_v37  ;;  %v3757_v2 = vsub.f32 %v3585_v9, %v568_v37  ;;  %v663_v4 = vmul.f32 %v3742_v5, %v3742_v5  ;;  %v664_v8 = vmul.f32 %v3745_v6, %v3745_v6 }
 0x106   : > { %726 = vadd.xlane.f32.xlu0 %v725_v42  ;;  %v569_v58 = vmul.f32 0.00390625, %v482_v49  ;;  %v485_v61 = vpop.xlane.xlu1 %484  ;;  %v731_v63 = vadd.f32 %v666_v55, %v665_v54  ;;  %v531_v9 = vadd.f32 %v3767_v60, %v3764_v59  ;;  %v3796_v49 = vld [vmem:[%s3545_s13 + $0x170] sm:$0xff]  ;;  %v3799_v55 = vld [vmem:[%s3545_s13 + $0x178] sm:$0xff] }
 0x107   : > { %4616 = vst [vmem:[#allocation23_spill] sm:$0xff] %v3748_v45  ;;  %v728_v62 = vadd.f32 %v664_v8, %v663_v4  ;;  %v570_v3 = vmul.f32 0.00390625, %v485_v61  ;;  %v667_v7 = vmul.f32 %v3748_v45, %v3748_v45  ;;  %v668_v36 = vmul.f32 %v3757_v2, %v3757_v2  ;;  %v2996_v8 = vld [vmem:[#allocation7 + $0x38] sm:$0xff]  }
 0x108   : > { %v3774_v16 = vsub.f32 %v3592_v12, %v569_v58  ;;  %v3777_v23 = vsub.f32 %v3595_v13, %v569_v58  ;;  %v488_v37 = vpop.xlane.xlu0 %487  ;;  %v534_v12 = vadd.f32 %v3783_v33, %v3780_v30  ;;  %v2997_v58 = vld [vmem:[#allocation8 + $0x38] sm:$0xff]   ;;  %2651 = vmatpush3.bf16.msra.mxu0 %v2996_v8  ;;  %v537_v61 = vadd.f32 %v3799_v55, %v3796_v49 }
 0x109   : > { %729 = vadd.xlane.f32.xlu1 %v728_v62  ;;  %v3788_v42 = vsub.f32 %v3598_v14, %v570_v3  ;;  %v734_v13 = vadd.f32 %v668_v36, %v667_v7  ;;  %v571_v54 = vmul.f32 0.00390625, %v488_v37  ;;  %2763 = vmatpush3.bf16.msra.mxu1 %v2997_v58  ;;  %v2998_v7 = vld [vmem:[#allocation7 + $0x70] sm:$0xff]   ;;  %v3821_v58 = vld [vmem:[%s3545_s13 + $0x188] sm:$0xff] }
 0x10a   : > { %529 = vadd.xlane.f32.xlu0 %v528_v48  ;;  %4617 = vst [vmem:[#allocation24_spill] sm:$0xff] %v3774_v16  ;;  %4618 = vst [vmem:[#allocation25_spill] sm:$0xff] %v3777_v23  ;;  %v3791_v48 = vsub.f32 %v3601_v15, %v570_v3  ;;  %v669_v4 = vmul.f32 %v3774_v16, %v3774_v16  ;;  %v670_v14 = vmul.f32 %v3777_v23, %v3777_v23  ;;  %v491_v15 = vpop.xlane.xlu1 %490  ;;  %v3812_v3 = vld [vmem:[%s3545_s13 + $0x180] sm:$0xff]  ;;  %v2999_v36 = vld [vmem:[#allocation8 + $0x70] sm:$0xff]  }
 0x10b   : > { %4619 = vst [vmem:[#allocation26_spill] sm:$0xff] %v3788_v42  ;;  %v572_v62 = vmul.f32 0.00390625, %v491_v15  ;;  %v3815_v37 = vsub.f32 %v3608_v18, %v571_v54  ;;  %v3818_v8 = vsub.f32 %v3611_v19, %v571_v54  ;;  %v3001_v16 = vld [vmem:[#allocation8 + $0x30] sm:$0xff]   ;;  %2652 = vmatprep.subr.bf16.mxu0 %v2998_v7  ;;  %2764 = vmatprep.subr.bf16.mxu1 %v2999_v36  ;;  %v3002_v54 = vld [vmem:[#allocation7 + $0x68] sm:$0xff]   ;;  %v3007_v23 = vld [vmem:[#allocation8 + $0x60] sm:$0xff]  }
 0x10c   : > { %4620 = vst [vmem:[#allocation27_spill] sm:$0xff] %v3791_v48  ;;  %v737_v15 = vadd.f32 %v670_v14, %v669_v4  ;;  %v540_v19 = vadd.f32 %v3821_v58, %v3812_v3  ;;  %v3003_v4 = vld [vmem:[#allocation8 + $0x68] sm:$0xff]  }
 0x10d   : > { %532 = vadd.xlane.f32.xlu1 %v531_v9  ;;  %v672_v9 = vmul.f32 %v3791_v48, %v3791_v48  ;;  %4621 = vst [vmem:[#allocation28_spill] sm:$0xff] %v3815_v37  ;;  %4622 = vst [vmem:[#allocation29_spill] sm:$0xff] %v3818_v8  ;;  %v494_v48 = vpop.xlane.xlu0 %493  ;;  %2765 = vmatpush3.bf16.msra.mxu1 %v3001_v16  ;;  %v3827_v18 = vsub.f32 %v3617_v21, %v572_v62  ;;  %v3005_v36 = vld [vmem:[#allocation8 + $0x28] sm:$0xff]  }
 0x10e   : > { %732 = vadd.xlane.f32.xlu0 %v731_v63  ;;  %v671_v63 = vmul.f32 %v3788_v42, %v3788_v42  ;;  %v3000_v42 = vld [vmem:[#allocation7 + $0x30] sm:$0xff]   ;;  %v573_v7 = vmul.f32 0.00390625, %v494_v48  ;;  %v674_v21 = vmul.f32 %v3818_v8, %v3818_v8  ;;  %v497_v16 = vpop.xlane.xlu1 %496  ;;  %2766 = vmatprep.subr.bf16.mxu1 %v3003_v4  ;;  %v3006_v8 = vld [vmem:[#allocation7 + $0x60] sm:$0xff]  }
 0x10f   : > { %2653 = vmatpush3.bf16.msra.mxu0 %v3000_v42  ;;  %4624 = vst [vmem:[#allocation31_spill] sm:$0xff] %v3827_v18  ;;  %v3835_v42 = vld [vmem:[%s3545_s13 + $0x198] sm:$0xff]  ;;  %v574_v48 = vmul.f32 0.00390625, %v497_v16 }
 0x110   : > { %v740_v14 = vadd.f32 %v672_v9, %v671_v63  ;;  %2654 = vmatprep.subr.bf16.mxu0 %v3002_v54  ;;  %v676_v9 = vmul.f32 %v3827_v18, %v3827_v18  ;;  %v3851_v54 = vsub.f32 %v3624_v24, %v573_v7  ;;  %v3854_v4 = vsub.f32 %v3627_v25, %v573_v7 }
 0x111   : > { %735 = vadd.xlane.f32.xlu1 %v734_v13  ;;  %v3832_v13 = vld [vmem:[%s3545_s13 + $0x190] sm:$0xff]  ;;  %2767 = vmatpush3.bf16.msra.mxu1 %v3005_v36  ;;  %v3008_v36 = vld [vmem:[#allocation7 + $0x20] sm:$0xff]   ;;  %v3863_v24 = vsub.f32 %v3633_v27, %v574_v48 }
 0x112   : > { %535 = vadd.xlane.f32.xlu0 %v534_v12  ;;  %v3824_v12 = vsub.f32 %v3614_v20, %v572_v62  ;;  %v673_v20 = vmul.f32 %v3815_v37, %v3815_v37  ;;  %v3004_v62 = vld [vmem:[#allocation7 + $0x28] sm:$0xff]   ;;  %v500_v37 = vpop.xlane.xlu0 %499  ;;  %4625 = vst [vmem:[#allocation32_spill] sm:$0xff] %v3851_v54  ;;  %4626 = vst [vmem:[#allocation33_spill] sm:$0xff] %v3854_v4  ;;  %2768 = vmatprep.subr.bf16.mxu1 %v3007_v23  ;;  %v503_v18 = vpop.xlane.xlu1 %502 }
 0x113   : > { %2655 = vmatpush3.bf16.msra.mxu0 %v3004_v62  ;;  %v3857_v62 = vld [vmem:[%s3545_s13 + $0x1a8] sm:$0xff]  ;;  %4628 = vst [vmem:[#allocation35_spill] sm:$0xff] %v3863_v24  ;;  %v575_v23 = vmul.f32 0.00390625, %v500_v37  ;;  %v678_v27 = vmul.f32 %v3854_v4, %v3854_v4  ;;  %v576_v37 = vmul.f32 0.00390625, %v503_v18  ;;  %v3014_v4 = vld [vmem:[#allocation7 + $0x50] sm:$0xff]  }
 0x114   : > { %4623 = vst [vmem:[#allocation30_spill] sm:$0xff] %v3824_v12  ;;  %v675_v63 = vmul.f32 %v3824_v12, %v3824_v12  ;;  %v743_v16 = vadd.f32 %v674_v21, %v673_v20  ;;  %v3009_v12 = vld [vmem:[#allocation8 + $0x20] sm:$0xff]   ;;  %2656 = vmatprep.subr.bf16.mxu0 %v3006_v8  ;;  %v3871_v8 = vld [vmem:[%s3545_s13 + $0x1b8] sm:$0xff] }
 0x115   : > { %538 = vadd.xlane.f32.xlu1 %v537_v61  ;;  %v543_v61 = vadd.f32 %v3835_v42, %v3832_v13  ;;  %2769 = vmatpush3.bf16.msra.mxu1 %v3009_v12  ;;  %4630 = vst [vmem:[#allocation37_spill] sm:$0xff] %v3871_v8  ;;  %v3010_v12 = vld [vmem:[#allocation7 + $0x58] sm:$0xff]   ;;  %v3893_v18 = vld [vmem:[%s3545_s13 + $0x1c8] sm:$0xff] }
 0x116   : > { %738 = vadd.xlane.f32.xlu0 %v737_v15  ;;  %v3848_v15 = vld [vmem:[%s3545_s13 + $0x1a0] sm:$0xff]  ;;  %v506_v7 = vpop.xlane.xlu0 %505  ;;  %v746_v20 = vadd.f32 %v676_v9, %v675_v63  ;;  %v509_v45 = vpop.xlane.xlu1 %508  ;;  %v680_v9 = vmul.f32 %v3863_v24, %v3863_v24  ;;  %v3016_v24 = vld [vmem:[#allocation7 + $0x10] sm:$0xff]  }
 0x117   : > { %2657 = vmatpush3.bf16.msra.mxu0 %v3008_v36  ;;  %v546_v25 = vadd.f32 %v3857_v62, %v3848_v15  ;;  %v3011_v21 = vld [vmem:[#allocation8 + $0x58] sm:$0xff]  }
 0x118   : > { %v3013_v36 = vld [vmem:[#allocation8 + $0x18] sm:$0xff]   ;;  %2658 = vmatprep.subr.bf16.mxu0 %v3010_v12  ;;  %2770 = vmatprep.subr.bf16.mxu1 %v3011_v21  ;;  %v3890_v12 = vsub.f32 %v3639_v29, %v575_v23 }
 0x119   : > { %741 = vadd.xlane.f32.xlu1 %v740_v14  ;;  %v3860_v14 = vsub.f32 %v3630_v26, %v574_v48  ;;  %v677_v26 = vmul.f32 %v3851_v54, %v3851_v54  ;;  %v3012_v48 = vld [vmem:[#allocation7 + $0x18] sm:$0xff]   ;;  %2771 = vmatpush3.bf16.msra.mxu1 %v3013_v36  ;;  %v3887_v54 = vsub.f32 %v3636_v28, %v575_v23 }
 0x11a   : > { %541 = vadd.xlane.f32.xlu0 %v540_v19  ;;  %v3868_v19 = vld [vmem:[%s3545_s13 + $0x1b0] sm:$0xff]  ;;  %4632 = vst [vmem:[#allocation39_spill] sm:$0xff] %v3890_v12  ;;  %v3899_v28 = vsub.f32 %v3647_v32, %v576_v37  ;;  %v515_v32 = vpop.xlane.xlu1 %514 }
 0x11b   : > { %4627 = vst [vmem:[#allocation34_spill] sm:$0xff] %v3860_v14  ;;  %4629 = vst [vmem:[#allocation36_spill] sm:$0xff] %v3868_v19  ;;  %v679_v63 = vmul.f32 %v3860_v14, %v3860_v14  ;;  %2659 = vmatpush3.bf16.msra.mxu0 %v3012_v48  ;;  %v749_v21 = vadd.f32 %v678_v27, %v677_v26  ;;  %v3015_v14 = vld [vmem:[#allocation8 + $0x50] sm:$0xff]   ;;  %v3019_v27 = vld [vmem:[#allocation8 + $0x48] sm:$0xff]  }
 0x11c   : > { %4631 = vst [vmem:[#allocation38_spill] sm:$0xff] %v3887_v54  ;;  %2660 = vmatprep.subr.bf16.mxu0 %v3014_v4  ;;  %2772 = vmatprep.subr.bf16.mxu1 %v3015_v14  ;;  %4634 = vst [vmem:[#allocation41_spill] sm:$0xff] %v3899_v28  ;;  %v3904_v26 = vld [vmem:[%s3545_s13 + $0x1d0] sm:$0xff]  ;;  %v681_v4 = vmul.f32 %v3887_v54, %v3887_v54  ;;  %v3911_v48 = vld [vmem:[%s3545_s13 + $0x1d8] sm:$0xff] }
 0x11d   : > { %544 = vadd.xlane.f32.xlu1 %v543_v61  ;;  %v549_v61 = vadd.f32 %v3871_v8, %v3868_v19  ;;  %v512_v8 = vpop.xlane.xlu0 %511  ;;  %v3017_v19 = vld [vmem:[#allocation8 + $0x10] sm:$0xff]   ;;  %v752_v23 = vadd.f32 %v680_v9, %v679_v63  ;;  %v3018_v14 = vld [vmem:[#allocation7 + $0x48] sm:$0xff]   ;;  %v3921_v63 = vld [vmem:[%s3545_s13 + $0x1e0] sm:$0xff] }
 0x11e   : > { %744 = vadd.xlane.f32.xlu0 %v743_v16  ;;  %v3884_v16 = vld [vmem:[%s3545_s13 + $0x1c0] sm:$0xff]  ;;  %2773 = vmatpush3.bf16.msra.mxu1 %v3017_v19  ;;  %v3021_v19 = vld [vmem:[#allocation8 + $0x8] sm:$0xff]  }
 0x11f   : > { %v552_v29 = vadd.f32 %v3893_v18, %v3884_v16  ;;  %2661 = vmatpush3.bf16.msra.mxu0 %v3016_v24  ;;  %v3020_v24 = vld [vmem:[#allocation7 + $0x8] sm:$0xff]   ;;  %2774 = vmatprep.subr.bf16.mxu1 %v3019_v27  ;;  %v3023_v54 = vld [vmem:[#allocation8 + $0x40] sm:$0xff]  }
 0x120   : > { %2662 = vmatprep.subr.bf16.mxu0 %v3018_v14  ;;  %v579_v14 = vmul.f32 0.00390625, %v512_v8  ;;  %v3929_v27 = vld [vmem:[%s3545_s13 + $0x1e8] sm:$0xff] }
 0x121   : > { %747 = vadd.xlane.f32.xlu1 %v746_v20  ;;  %v577_v20 = vmul.f32 0.00390625, %v506_v7  ;;  %v578_v7 = vmul.f32 0.00390625, %v509_v45  ;;  %v518_v9 = vpop.xlane.xlu0 %517  ;;  %v558_v8 = vadd.f32 %v3929_v27, %v3921_v63 }
 0x122   : > { %547 = vadd.xlane.f32.xlu0 %v546_v25  ;;  %v3896_v25 = vsub.f32 %v3644_v31, %v576_v37  ;;  %v682_v31 = vmul.f32 %v3890_v12, %v3890_v12  ;;  %v684_v37 = vmul.f32 %v3899_v28, %v3899_v28  ;;  %2775 = vmatpush3.bf16.msra.mxu1 %v3021_v19  ;;  %v3024_v12 = vld [vmem:[#allocation7] sm:$0xff]  }
 0x123   : > { %v3914_v36 = vsub.f32 %v3652_v34, %v577_v20  ;;  %2663 = vmatpush3.bf16.msra.mxu0 %v3020_v24  ;;  %v3924_v45 = vsub.f32 %v3655_v35, %v577_v20  ;;  %v555_v34 = vadd.f32 %v3911_v48, %v3904_v26  ;;  %v3932_v28 = vsub.f32 %v3662_v38, %v578_v7  ;;  %v3025_v24 = vld [vmem:[#allocation8] sm:$0xff]   ;;  %v521_v20 = vpop.xlane.xlu1 %520 }
 0x124   : > { %4633 = vst [vmem:[#allocation40_spill] sm:$0xff] %v3896_v25  ;;  %v580_v35 = vmul.f32 0.00390625, %v515_v32  ;;  %2776 = vmatprep.subr.bf16.mxu1 %v3023_v54  ;;  %v3951_v54 = vld [vmem:[%s3545_s13 + $0x1f8] sm:$0xff] }
 0x125   : > { %550 = vadd.xlane.f32.xlu1 %v549_v61  ;;  %v683_v61 = vmul.f32 %v3896_v25, %v3896_v25  ;;  %v3022_v25 = vld [vmem:[#allocation7 + $0x40] sm:$0xff]   ;;  %v685_v38 = vmul.f32 %v3914_v36, %v3914_v36  ;;  %v686_v32 = vmul.f32 %v3924_v45, %v3924_v45 }
 0x126   : > { %750 = vadd.xlane.f32.xlu0 %v749_v21  ;;  %v755_v21 = vadd.f32 %v682_v31, %v681_v4  ;;  %2664 = vmatprep.subr.bf16.mxu0 %v3022_v25  ;;  %v581_v4 = vmul.f32 0.00390625, %v518_v9  ;;  %v3945_v31 = vsub.f32 %v3671_v41, %v579_v14  ;;  %v3948_v25 = vld [vmem:[%s3545_s13 + $0x1f0] sm:$0xff]  ;;  %v3958_v19 = vsub.f32 %v3676_v43, %v580_v35  ;;  %s4456_s13 = scalar_lea.hbm %s4665_s25, %s2389_s30 }
 0x127   : > { %2665 = vmatpush3.bf16.msra.mxu0 %v3024_v12  ;;  %2777 = vmatpush3.bf16.msra.mxu1 %v3025_v24  ;;  %v687_v12 = vmul.f32 %v3932_v28, %v3932_v28  ;;  %v761_v43 = vadd.f32 %v686_v32, %v685_v38  ;;  %v527_v24 = vpop.xlane.xlu1 %526 }
 0x128   : > { %v3969_v9 = vsub.f32 %v3687_v47, %v581_v4  ;;  %v691_v47 = vmul.f32 %v3958_v19, %v3958_v19 }
 0x129   : > { %753 = vadd.xlane.f32.xlu1 %v752_v23  ;;  %v758_v23 = vadd.f32 %v684_v37, %v683_v61  ;;  %v582_v61 = vmul.f32 0.00390625, %v521_v20  ;;  %v3966_v37 = vsub.f32 %v3684_v46, %v581_v4 }
 0x12a   : > { %553 = vadd.xlane.f32.xlu0 %v552_v29  ;;  %v3935_v29 = vsub.f32 %v3665_v39, %v578_v7  ;;  %v3942_v39 = vsub.f32 %v3668_v40, %v579_v14  ;;  %v524_v7 = vpop.xlane.xlu0 %523  ;;  %v3961_v40 = vsub.f32 %v3679_v44, %v580_v35  ;;  %v690_v14 = vmul.f32 %v3945_v31, %v3945_v31 }
 0x12b   : > { %v3978_v46 = vsub.f32 %v3694_v50, %v582_v61  ;;  %v693_v4 = vmul.f32 %v3966_v37, %v3966_v37  ;;  %v694_v38 = vmul.f32 %v3969_v9, %v3969_v9 }
 0x12c   : > { %v688_v41 = vmul.f32 %v3935_v29, %v3935_v29  ;;  %v689_v44 = vmul.f32 %v3942_v39, %v3942_v39  ;;  %v692_v20 = vmul.f32 %v3961_v40, %v3961_v40 }
 0x12d   : > { %556 = vadd.xlane.f32.xlu1 %v555_v34  ;;  %v561_v34 = vadd.f32 %v3951_v54, %v3948_v25 }
 0x12e   : > { %756 = vadd.xlane.f32.xlu0 %v755_v21  ;;  %v583_v21 = vmul.f32 0.00390625, %v524_v7  ;;  %v764_v35 = vadd.f32 %v688_v41, %v687_v12  ;;  %v767_v7 = vadd.f32 %v690_v14, %v689_v44  ;;  %v770_v12 = vadd.f32 %v692_v20, %v691_v47 }
 0x12f   : > { %v695_v41 = vmul.f32 %v3978_v46, %v3978_v46 }
 0x130   : > { %v3992_v50 = vsub.f32 %v3700_v52, %v583_v21  ;;  %v3995_v32 = vsub.f32 %v3703_v53, %v583_v21 }
 0x131   : > { %759 = vadd.xlane.f32.xlu1 %v758_v23  ;;  %v3985_v23 = vsub.f32 %v3697_v51, %v582_v61  ;;  %v773_v61 = vadd.f32 %v694_v38, %v693_v4 }
 0x132   : > { %559 = vadd.xlane.f32.xlu0 %v558_v8  ;;  %v584_v8 = vmul.f32 0.00390625, %v527_v24  ;;  %v697_v53 = vmul.f32 %v3992_v50, %v3992_v50 }
 0x133   : > { %v696_v24 = vmul.f32 %v3985_v23, %v3985_v23 }
 0x134   : > { %v3998_v51 = vsub.f32 %v3710_v56, %v584_v8  ;;  %v4005_v52 = vsub.f32 %v3713_v57, %v584_v8 }
 0x135   : > { %562 = vadd.xlane.f32.xlu1 %v561_v34  ;;  %v698_v34 = vmul.f32 %v3995_v32, %v3995_v32  ;;  %v776_v56 = vadd.f32 %v696_v24, %v695_v41 }
 0x136   : > { %762 = vadd.xlane.f32.xlu0 %v761_v43  ;;  %v699_v21 = vmul.f32 %v3998_v51, %v3998_v51  ;;  %v700_v44 = vmul.f32 %v4005_v52, %v4005_v52 }
 0x137   : > { %v779_v43 = vadd.f32 %v698_v34, %v697_v53 }
 0x138   : > { %v782_v57 = vadd.f32 %v700_v44, %v699_v21 }
 0x139   : > { %765 = vadd.xlane.f32.xlu1 %v764_v35 }
 0x13a   : > { %768 = vadd.xlane.f32.xlu0 %v767_v7  ;;  %v982_v7 = vlaneseq }
 0x13c   : > { %v983_v44 = vshrl.u32 %v982_v7, 7 }
 0x13d   : > { %771 = vadd.xlane.f32.xlu1 %v770_v12 }
 0x13e   : > { %774 = vadd.xlane.f32.xlu0 %v773_v61  ;;  %v984_v7 = vsub.s32 0, %v983_v44 }
 0x141   : > { %777 = vadd.xlane.f32.xlu1 %v776_v56 }
 0x142   : > { %780 = vadd.xlane.f32.xlu0 %v779_v43 }
 0x145   : > { %783 = vadd.xlane.f32.xlu1 %v782_v57 }
 0x18f   : > { %v727_v14 = vpop.xlane.xlu0 %726 }
 0x190   : > { %v821_v35 = vmul.f32 0.00390625, %v727_v14 }
 0x192   : > { %v853_v47 = vadd.f32 1e-05, %v821_v35  ;;  %v730_v20 = vpop.xlane.xlu1 %729 }
 0x193   : > { %v530_v8 = vpop.xlane.xlu0 %529  ;;  %v822_v4 = vmul.f32 0.00390625, %v730_v20 }
 0x194   : > { %3026 = vrsqrt.f32 %v853_v47  ;;  %v585_v38 = vmul.f32 0.00390625, %v530_v8 }
 0x195   : > { %v854_v12 = vadd.f32 1e-05, %v822_v4 }
 0x196   : > { %v4016_v61 = vsub.f32 %v3736_v0, %v585_v38  ;;  %v4019_v41 = vsub.f32 %v3739_v1, %v585_v38  ;;  %v533_v24 = vpop.xlane.xlu1 %532 }
 0x197   : > { %v733_v53 = vpop.xlane.xlu0 %732  ;;  %3028 = vrsqrt.f32 %v854_v12  ;;  %v586_v34 = vmul.f32 0.00390625, %v533_v24 }
 0x198   : > { %v823_v56 = vmul.f32 0.00390625, %v733_v53  ;;  %v701_v43 = vmul.f32 %v4016_v61, %v4016_v61  ;;  %v702_v21 = vmul.f32 %v4019_v41, %v4019_v41  ;;  %v466_v53 = vld [vmem:[#allocation5] sm:$0x3] }
 0x199   : > { %v4026_v57 = vsub.f32 %v3764_v59, %v586_v34  ;;  %v4029_v0 = vsub.f32 %v3767_v60, %v586_v34  ;;  %v988_v59 = vsub.s32 1, %v983_v44  ;;  %v467_v44 = vld [vmem:[%s4547_s2] sm:$0x3] }
 0x19a   : > { %v855_v1 = vadd.f32 1e-05, %v823_v56  ;;  %v736_v14 = vpop.xlane.xlu1 %735  ;;  %v785_v47 = vadd.f32 %v702_v21, %v701_v43 }
 0x19b   : > { %4635 = vst [vmem:[#allocation42_spill] sm:$0xff] %v4026_v57  ;;  %v536_v35 = vpop.xlane.xlu0 %535  ;;  %v824_v20 = vmul.f32 0.00390625, %v736_v14  ;;  %v703_v4 = vmul.f32 %v4026_v57, %v4026_v57  ;;  %v704_v38 = vmul.f32 %v4029_v0, %v4029_v0 }
 0x19c   : > { %3030 = vrsqrt.f32 %v855_v1  ;;  %v587_v8 = vmul.f32 0.00390625, %v536_v35  ;;  %786 = vadd.xlane.f32.xlu0 %v785_v47  ;;  %v4050_v47 = vrot.slane %v466_v53, %v988_v59 }
 0x19d   : > { %v856_v12 = vadd.f32 1e-05, %v824_v20  ;;  %v788_v43 = vadd.f32 %v704_v38, %v703_v4 }
 0x19e   : > { %v4036_v60 = vsub.f32 %v3780_v30, %v587_v8  ;;  %v4039_v24 = vsub.f32 %v3783_v33, %v587_v8  ;;  %v539_v34 = vpop.xlane.xlu1 %538  ;;  %v4048_v33 = vrot.slane %v466_v53, %v984_v7 }
 0x19f   : > { %v739_v56 = vpop.xlane.xlu0 %738  ;;  %3032 = vrsqrt.f32 %v856_v12  ;;  %v588_v21 = vmul.f32 0.00390625, %v539_v34  ;;  %789 = vadd.xlane.f32.xlu1 %v788_v43  ;;  %v4059_v43 = vrot.slane %v467_v44, %v988_v59 }
 0x1a0   : > { %4636 = vst [vmem:[#allocation43_spill] sm:$0xff] %v4036_v60  ;;  %4637 = vst [vmem:[#allocation44_spill] sm:$0xff] %v4039_v24  ;;  %v825_v1 = vmul.f32 0.00390625, %v739_v56  ;;  %v705_v14 = vmul.f32 %v4036_v60, %v4036_v60  ;;  %v706_v30 = vmul.f32 %v4039_v24, %v4039_v24 }
 0x1a1   : > { %v3027_v35 = vpop.eup %3026  ;;  %v4053_v20 = vsub.f32 %v3796_v49, %v588_v21  ;;  %v4056_v8 = vsub.f32 %v3799_v55, %v588_v21  ;;  %v4067_v21 = vrot.slane %v467_v44, %v984_v7 }
 0x1a2   : > { %v857_v4 = vadd.f32 1e-05, %v825_v1  ;;  %v918_v38 = vmul.f32 %v3027_v35, %v3723_v11  ;;  %v742_v12 = vpop.xlane.xlu1 %741  ;;  %v791_v56 = vadd.f32 %v706_v30, %v705_v14  ;;  %v917_v60 = vmul.f32 %v3027_v35, %v3720_v10 }
 0x1a3   : > { %v542_v34 = vpop.xlane.xlu0 %541  ;;  %v826_v24 = vmul.f32 0.00390625, %v742_v12  ;;  %v707_v49 = vmul.f32 %v4053_v20, %v4053_v20  ;;  %v708_v55 = vmul.f32 %v4056_v8, %v4056_v8 }
 0x1a4   : > { %3034 = vrsqrt.f32 %v857_v4  ;;  %v589_v53 = vmul.f32 0.00390625, %v542_v34  ;;  %v3029_v57 = vpop.eup %3028  ;;  %792 = vadd.xlane.f32.xlu0 %v791_v56  ;;  %v993_v11 = vmul.f32 %v4050_v47, %v918_v38  ;;  %v992_v59 = vmul.f32 %v4048_v33, %v917_v60 }
 0x1a5   : > { %v858_v1 = vadd.f32 1e-05, %v826_v24  ;;  %v920_v35 = vmul.f32 %v3029_v57, %v3745_v6  ;;  %v794_v12 = vadd.f32 %v708_v55, %v707_v49  ;;  %v919_v38 = vmul.f32 %v3029_v57, %v3742_v5 }
 0x1a6   : > { %v4071_v10 = vsub.f32 %v3812_v3, %v589_v53  ;;  %v4074_v14 = vsub.f32 %v3821_v58, %v589_v53  ;;  %v545_v30 = vpop.xlane.xlu1 %544  ;;  %v1068_v34 = vadd.f32 %v4059_v43, %v993_v11  ;;  %v1067_v56 = vadd.f32 %v4067_v21, %v992_v59 }
 0x1a7   : > { %v745_v4 = vpop.xlane.xlu0 %744  ;;  %3036 = vrsqrt.f32 %v858_v1  ;;  %v590_v7 = vmul.f32 0.00390625, %v545_v30  ;;  %795 = vadd.xlane.f32.xlu1 %v794_v12  ;;  %v995_v6 = vmul.f32 %v4050_v47, %v920_v35  ;;  %v994_v24 = vmul.f32 %v4048_v33, %v919_v38 }
 0x1a8   : > { %v827_v44 = vmul.f32 0.00390625, %v745_v4  ;;  %v709_v60 = vmul.f32 %v4071_v10, %v4071_v10  ;;  %v710_v58 = vmul.f32 %v4074_v14, %v4074_v14 }
 0x1a9   : > { %v3031_v3 = vpop.eup %3030  ;;  %v4087_v53 = vsub.f32 %v3832_v13, %v590_v7  ;;  %v4090_v5 = vsub.f32 %v3835_v42, %v590_v7  ;;  %v1070_v30 = vadd.f32 %v4059_v43, %v995_v6  ;;  %v1069_v35 = vadd.f32 %v4067_v21, %v994_v24 }
 0x1aa   : > { %v859_v57 = vadd.f32 1e-05, %v827_v44  ;;  %v922_v49 = vmul.f32 %v3031_v3, %v3729_v22  ;;  %v748_v55 = vpop.xlane.xlu1 %747  ;;  %v797_v1 = vadd.f32 %v710_v58, %v709_v60  ;;  %v921_v4 = vmul.f32 %v3031_v3, %v3726_v17 }
 0x1ab   : > { %v548_v11 = vpop.xlane.xlu0 %547  ;;  %v828_v59 = vmul.f32 0.00390625, %v748_v55  ;;  %v711_v13 = vmul.f32 %v4087_v53, %v4087_v53  ;;  %v1132_v38 = vpack.c.bf16 %v1070_v30, %v1068_v34  ;;  %v1131_v7 = vpack.c.bf16 %v1069_v35, %v1067_v56 }
 0x1ac   : > { %3038 = vrsqrt.f32 %v859_v57  ;;  %v591_v12 = vmul.f32 0.00390625, %v548_v11  ;;  %v3033_v42 = vpop.eup %3032  ;;  %798 = vadd.xlane.f32.xlu0 %v797_v1  ;;  %v712_v22 = vmul.f32 %v4090_v5, %v4090_v5  ;;  %v997_v44 = vmul.f32 %v4050_v47, %v922_v49  ;;  %v4638_v57 = vld [vmem:[#allocation23_spill] sm:$0xff] }
 0x1ad   : > { %v860_v60 = vadd.f32 1e-05, %v828_v59  ;;  %v924_v3 = vmul.f32 %v3033_v42, %v3757_v2  ;;  %1330 = vmatprep.mubr.bf16.mxu0 %v1132_v38  ;;  %1626 = vmatprep.mubr.bf16.mxu1 %v1132_v38  ;;  %v923_v55 = vmul.f32 %v3033_v42, %v4638_v57  ;;  %v996_v30 = vmul.f32 %v4048_v33, %v921_v4  ;;  %v4639_v59 = vld [vmem:[#allocation36_spill] sm:$0xff] }
 0x1ae   : > { %v4102_v58 = vsub.f32 %v3848_v15, %v591_v12  ;;  %v4105_v17 = vsub.f32 %v3857_v62, %v591_v12  ;;  %v551_v6 = vpop.xlane.xlu1 %550  ;;  %v800_v34 = vadd.f32 %v712_v22, %v711_v13  ;;  %v1072_v56 = vadd.f32 %v4059_v43, %v997_v44  ;;  %1331 = vmatmul.mubr.bf16.vlgmr.msra.gmra.mxu0 %v1131_v7  ;;  %v4640_v13 = vld [vmem:[#allocation37_spill] sm:$0xff] }
 0x1af   : > { %v751_v24 = vpop.xlane.xlu0 %750  ;;  %3040 = vrsqrt.f32 %v860_v60  ;;  %v592_v49 = vmul.f32 0.00390625, %v551_v6  ;;  %1627 = vmatmul.mubr.bf16.vlgmr.msra.gmra.mxu1 %v1131_v7  ;;  %v999_v1 = vmul.f32 %v4050_v47, %v924_v3  ;;  %v998_v35 = vmul.f32 %v4048_v33, %v923_v55  ;;  %v4641_v7 = vld [vmem:[#allocation25_spill] sm:$0xff] }
 0x1b0   : > { %v829_v15 = vmul.f32 0.00390625, %v751_v24  ;;  %v713_v62 = vmul.f32 %v4102_v58, %v4102_v58  ;;  %801 = vadd.xlane.f32.xlu1 %v800_v34  ;;  %v714_v2 = vmul.f32 %v4105_v17, %v4105_v17  ;;  %v1071_v3 = vadd.f32 %v4067_v21, %v996_v30 }
 0x1b1   : > { %v3035_v11 = vpop.eup %3034  ;;  %v4118_v12 = vsub.f32 %v4639_v59, %v592_v49  ;;  %v4121_v42 = vsub.f32 %v4640_v13, %v592_v49  ;;  %v1074_v24 = vadd.f32 %v4059_v43, %v999_v1  ;;  %v1073_v4 = vadd.f32 %v4067_v21, %v998_v35  ;;  %v4642_v35 = vld [vmem:[#allocation27_spill] sm:$0xff] }
 0x1b2   : > { %v861_v38 = vadd.f32 1e-05, %v829_v15  ;;  %v926_v22 = vmul.f32 %v3035_v11, %v4641_v7  ;;  %v754_v44 = vpop.xlane.xlu1 %753  ;;  %v803_v6 = vadd.f32 %v714_v2, %v713_v62 }
 0x1b3   : > { %v554_v60 = vpop.xlane.xlu0 %553  ;;  %v830_v34 = vmul.f32 0.00390625, %v754_v44  ;;  %v715_v55 = vmul.f32 %v4118_v12, %v4118_v12  ;;  %v1134_v15 = vpack.c.bf16 %v1074_v24, %v1072_v56  ;;  %v1133_v59 = vpack.c.bf16 %v1073_v4, %v1071_v3 }
 0x1b4   : > { %3042 = vrsqrt.f32 %v861_v38  ;;  %v593_v57 = vmul.f32 0.00390625, %v554_v60  ;;  %v3037_v49 = vpop.eup %3036  ;;  %804 = vadd.xlane.f32.xlu0 %v803_v6  ;;  %v716_v13 = vmul.f32 %v4121_v42, %v4121_v42  ;;  %v1001_v62 = vmul.f32 %v4050_v47, %v926_v22  ;;  %v4643_v6 = vld [vmem:[#allocation24_spill] sm:$0xff] }
 0x1b5   : > { %v862_v2 = vadd.f32 1e-05, %v830_v34  ;;  %v928_v38 = vmul.f32 %v3037_v49, %v4642_v35  ;;  %1338 = vmatprep.mubr.bf16.mxu0 %v1134_v15  ;;  %1634 = vmatprep.mubr.bf16.mxu1 %v1134_v15  ;;  %v925_v24 = vmul.f32 %v3035_v11, %v4643_v6 }
 0x1b6   : > { %v4133_v1 = vsub.f32 %v3884_v16, %v593_v57  ;;  %v4136_v30 = vsub.f32 %v3893_v18, %v593_v57  ;;  %v557_v7 = vpop.xlane.xlu1 %556  ;;  %v806_v56 = vadd.f32 %v716_v13, %v715_v55  ;;  %v1076_v60 = vadd.f32 %v4059_v43, %v1001_v62  ;;  %1339 = vmatmul.mubr.bf16.gmra.mxu0 %v1133_v59  ;;  %v4644_v57 = vld [vmem:[#allocation26_spill] sm:$0xff]  ;;  %v4645_v62 = vld [vmem:[#allocation29_spill] sm:$0xff] }
 0x1b7   : > { %v757_v44 = vpop.xlane.xlu0 %756  ;;  %3044 = vrsqrt.f32 %v862_v2  ;;  %v594_v22 = vmul.f32 0.00390625, %v557_v7  ;;  %1635 = vmatmul.mubr.bf16.gmra.mxu1 %v1133_v59  ;;  %v1003_v34 = vmul.f32 %v4050_v47, %v928_v38  ;;  %v927_v55 = vmul.f32 %v3037_v49, %v4644_v57 }
 0x1b8   : > { %v831_v16 = vmul.f32 0.00390625, %v757_v44  ;;  %v717_v18 = vmul.f32 %v4133_v1, %v4133_v1  ;;  %807 = vadd.xlane.f32.xlu1 %v806_v56  ;;  %v718_v4 = vmul.f32 %v4136_v30, %v4136_v30  ;;  %v1000_v15 = vmul.f32 %v4048_v33, %v925_v24 }
 0x1b9   : > { %v3039_v3 = vpop.eup %3038  ;;  %v4149_v11 = vsub.f32 %v3904_v26, %v594_v22  ;;  %v4152_v59 = vsub.f32 %v3911_v48, %v594_v22  ;;  %v1078_v56 = vadd.f32 %v4059_v43, %v1003_v34  ;;  %v1002_v38 = vmul.f32 %v4048_v33, %v927_v55 }
 0x1ba   : > { %v863_v13 = vadd.f32 1e-05, %v831_v16  ;;  %v930_v2 = vmul.f32 %v3039_v3, %v4645_v62  ;;  %v760_v35 = vpop.xlane.xlu1 %759  ;;  %v809_v44 = vadd.f32 %v718_v4, %v717_v18  ;;  %v1075_v49 = vadd.f32 %v4067_v21, %v1000_v15  ;;  %v4647_v15 = vld [vmem:[#allocation31_spill] sm:$0xff] }
 0x1bb   : > { %v560_v7 = vpop.xlane.xlu0 %559  ;;  %v832_v6 = vmul.f32 0.00390625, %v760_v35  ;;  %v719_v26 = vmul.f32 %v4149_v11, %v4149_v11  ;;  %v1136_v22 = vpack.c.bf16 %v1078_v56, %v1076_v60  ;;  %v1077_v16 = vadd.f32 %v4067_v21, %v1002_v38 }
 0x1bc   : > { %3046 = vrsqrt.f32 %v863_v13  ;;  %v595_v24 = vmul.f32 0.00390625, %v560_v7  ;;  %v3041_v48 = vpop.eup %3040  ;;  %810 = vadd.xlane.f32.xlu0 %v809_v44  ;;  %v720_v18 = vmul.f32 %v4152_v59, %v4152_v59  ;;  %v1005_v4 = vmul.f32 %v4050_v47, %v930_v2 }
 0x1bd   : > { %v864_v34 = vadd.f32 1e-05, %v832_v6  ;;  %v932_v13 = vmul.f32 %v3041_v48, %v4647_v15  ;;  %1346 = vmatprep.mubr.bf16.mxu0 %v1136_v22  ;;  %1642 = vmatprep.mubr.bf16.mxu1 %v1136_v22  ;;  %v1135_v60 = vpack.c.bf16 %v1077_v16, %v1075_v49 }
 0x1be   : > { %v4165_v57 = vsub.f32 %v3921_v63, %v595_v24  ;;  %v4168_v55 = vsub.f32 %v3929_v27, %v595_v24  ;;  %v563_v62 = vpop.xlane.xlu1 %562  ;;  %v812_v7 = vadd.f32 %v720_v18, %v719_v26  ;;  %v1080_v44 = vadd.f32 %v4059_v43, %v1005_v4  ;;  %v4648_v24 = vld [vmem:[#allocation28_spill] sm:$0xff]  ;;  %v4650_v18 = vld [vmem:[#allocation30_spill] sm:$0xff] }
 0x1bf   : > { %v763_v35 = vpop.xlane.xlu0 %762  ;;  %3048 = vrsqrt.f32 %v864_v34  ;;  %v596_v56 = vmul.f32 0.00390625, %v563_v62  ;;  %1347 = vmatmul.mubr.bf16.gmra.mxu0 %v1135_v60  ;;  %1643 = vmatmul.mubr.bf16.gmra.mxu1 %v1135_v60  ;;  %v1007_v6 = vmul.f32 %v4050_v47, %v932_v13  ;;  %v929_v49 = vmul.f32 %v3039_v3, %v4648_v24  ;;  %v4651_v13 = vld [vmem:[#allocation33_spill] sm:$0xff] }
 0x1c0   : > { %4646 = vst [vmem:[#allocation23_spill] sm:$0xff] %v4165_v57  ;;  %v833_v2 = vmul.f32 0.00390625, %v763_v35  ;;  %v721_v63 = vmul.f32 %v4165_v57, %v4165_v57  ;;  %v722_v27 = vmul.f32 %v4168_v55, %v4168_v55  ;;  %813 = vadd.xlane.f32.xlu1 %v812_v7  ;;  %v931_v4 = vmul.f32 %v3041_v48, %v4650_v18 }
 0x1c1   : > { %v3043_v38 = vpop.eup %3042  ;;  %v4179_v26 = vsub.f32 %v3948_v25, %v596_v56  ;;  %v4182_v22 = vsub.f32 %v3951_v54, %v596_v56  ;;  %v1082_v60 = vadd.f32 %v4059_v43, %v1007_v6  ;;  %v1004_v35 = vmul.f32 %v4048_v33, %v929_v49  ;;  %v4652_v49 = vld [vmem:[#allocation35_spill] sm:$0xff] }
 0x1c2   : > { %v865_v16 = vadd.f32 1e-05, %v833_v2  ;;  %v766_v34 = vpop.xlane.xlu1 %765  ;;  %v815_v62 = vadd.f32 %v722_v27, %v721_v63  ;;  %v934_v57 = vmul.f32 %v3043_v38, %v4651_v13  ;;  %v1006_v24 = vmul.f32 %v4048_v33, %v931_v4 }
 0x1c3   : > { %4649 = vst [vmem:[#allocation36_spill] sm:$0xff] %v4179_v26  ;;  %v769_v15 = vpop.xlane.xlu0 %768  ;;  %v834_v3 = vmul.f32 0.00390625, %v766_v34  ;;  %v1138_v56 = vpack.c.bf16 %v1082_v60, %v1080_v44  ;;  %v1079_v7 = vadd.f32 %v4067_v21, %v1004_v35  ;;  %v723_v48 = vmul.f32 %v4179_v26, %v4179_v26 }
 0x1c4   : > { %3050 = vrsqrt.f32 %v865_v16  ;;  %v835_v25 = vmul.f32 0.00390625, %v769_v15  ;;  %v3045_v54 = vpop.eup %3044  ;;  %816 = vadd.xlane.f32.xlu0 %v815_v62  ;;  %v724_v2 = vmul.f32 %v4182_v22, %v4182_v22  ;;  %v1081_v6 = vadd.f32 %v4067_v21, %v1006_v24  ;;  %v4653_v15 = vld [vmem:[#allocation32_spill] sm:$0xff] }
 0x1c5   : > { %v866_v63 = vadd.f32 1e-05, %v834_v3  ;;  %v936_v16 = vmul.f32 %v3045_v54, %v4652_v49  ;;  %1354 = vmatprep.mubr.bf16.mxu0 %v1138_v56  ;;  %1650 = vmatprep.mubr.bf16.mxu1 %v1138_v56  ;;  %v1009_v44 = vmul.f32 %v4050_v47, %v934_v57  ;;  %v933_v62 = vmul.f32 %v3043_v38, %v4653_v15 }
 0x1c6   : > { %v867_v27 = vadd.f32 1e-05, %v835_v25  ;;  %v772_v18 = vpop.xlane.xlu1 %771  ;;  %v818_v34 = vadd.f32 %v724_v2, %v723_v48  ;;  %v1137_v35 = vpack.c.bf16 %v1081_v6, %v1079_v7  ;;  %v4654_v25 = vld [vmem:[#allocation34_spill] sm:$0xff]  ;;  %v4655_v48 = vld [vmem:[#allocation39_spill] sm:$0xff] }
 0x1c7   : > { %v775_v4 = vpop.xlane.xlu0 %774  ;;  %3052 = vrsqrt.f32 %v866_v63  ;;  %v836_v60 = vmul.f32 0.00390625, %v772_v18  ;;  %v1011_v3 = vmul.f32 %v4050_v47, %v936_v16  ;;  %v935_v24 = vmul.f32 %v3045_v54, %v4654_v25  ;;  %v4656_v6 = vld [vmem:[#allocation38_spill] sm:$0xff]  ;;  %v4658_v25 = vld [vmem:[#allocation40_spill] sm:$0xff] }
 0x1c8   : > { %v837_v13 = vmul.f32 0.00390625, %v775_v4  ;;  %3054 = vrsqrt.f32 %v867_v27  ;;  %819 = vadd.xlane.f32.xlu1 %v818_v34  ;;  %1355 = vmatmul.mubr.bf16.gmra.mxu0 %v1137_v35  ;;  %v1084_v56 = vadd.f32 %v4059_v43, %v1009_v44  ;;  %v1008_v57 = vmul.f32 %v4048_v33, %v933_v62 }
 0x1c9   : > { %v3047_v26 = vpop.eup %3046  ;;  %v868_v49 = vadd.f32 1e-05, %v836_v60  ;;  %1651 = vmatmul.mubr.bf16.gmra.mxu1 %v1137_v35  ;;  %v1086_v7 = vadd.f32 %v4059_v43, %v1011_v3  ;;  %v1010_v27 = vmul.f32 %v4048_v33, %v935_v24  ;;  %v4657_v35 = vld [vmem:[#allocation41_spill] sm:$0xff] }
 0x1ca   : > { %v938_v38 = vmul.f32 %v3047_v26, %v4655_v48  ;;  %v869_v2 = vadd.f32 1e-05, %v837_v13  ;;  %v778_v63 = vpop.xlane.xlu1 %777  ;;  %v937_v18 = vmul.f32 %v3047_v26, %v4656_v6  ;;  %v1083_v15 = vadd.f32 %v4067_v21, %v1008_v57 }
 0x1cb   : > { %3056 = vrsqrt.f32 %v868_v49  ;;  %v838_v16 = vmul.f32 0.00390625, %v778_v63  ;;  %v781_v54 = vpop.xlane.xlu0 %780  ;;  %v1140_v34 = vpack.c.bf16 %v1086_v7, %v1084_v56  ;;  %v1085_v44 = vadd.f32 %v4067_v21, %v1010_v27 }
 0x1cc   : > { %v3049_v4 = vpop.eup %3048  ;;  %v1013_v62 = vmul.f32 %v4050_v47, %v938_v38  ;;  %3058 = vrsqrt.f32 %v869_v2  ;;  %v839_v24 = vmul.f32 0.00390625, %v781_v54  ;;  %v1012_v48 = vmul.f32 %v4048_v33, %v937_v18 }
 0x1cd   : > { %v870_v60 = vadd.f32 1e-05, %v838_v16  ;;  %v940_v13 = vmul.f32 %v3049_v4, %v4657_v35  ;;  %v939_v3 = vmul.f32 %v3049_v4, %v4658_v25  ;;  %1362 = vmatprep.mubr.bf16.mxu0 %v1140_v34  ;;  %1658 = vmatprep.mubr.bf16.mxu1 %v1140_v34  ;;  %v1139_v49 = vpack.c.bf16 %v1085_v44, %v1083_v15 }
 0x1ce   : > { %v784_v26 = vpop.xlane.xlu1 %783  ;;  %v1088_v7 = vadd.f32 %v4059_v43, %v1013_v62  ;;  %v871_v54 = vadd.f32 1e-05, %v839_v24  ;;  %v1087_v4 = vadd.f32 %v4067_v21, %v1012_v48 }
 0x1cf   : > { %3060 = vrsqrt.f32 %v870_v60  ;;  %v840_v56 = vmul.f32 0.00390625, %v784_v26  ;;  %v1015_v57 = vmul.f32 %v4050_v47, %v940_v13  ;;  %v1014_v63 = vmul.f32 %v4048_v33, %v939_v3 }
 0x1d0   : > { %1363 = vmatmul.mubr.bf16.gmra.mxu0 %v1139_v49 }
 0x1d1   : > { %v3051_v38 = vpop.eup %3050  ;;  %v872_v27 = vadd.f32 1e-05, %v840_v56  ;;  %1659 = vmatmul.mubr.bf16.gmra.mxu1 %v1139_v49  ;;  %v1090_v2 = vadd.f32 %v4059_v43, %v1015_v57  ;;  %v1089_v6 = vadd.f32 %v4067_v21, %v1014_v63 }
 0x1d2   : > { %v942_v16 = vmul.f32 %v3051_v38, %v3924_v45  ;;  %v941_v34 = vmul.f32 %v3051_v38, %v3914_v36 }
 0x1d3   : > { %v1142_v18 = vpack.c.bf16 %v1090_v2, %v1088_v7  ;;  %3062 = vrsqrt.f32 %v872_v27  ;;  %v1141_v60 = vpack.c.bf16 %v1089_v6, %v1087_v4 }
 0x1d4   : > { %v3053_v15 = vpop.eup %3052  ;;  %v1017_v44 = vmul.f32 %v4050_v47, %v942_v16  ;;  %3064 = vrsqrt.f32 %v871_v54  ;;  %v1016_v3 = vmul.f32 %v4048_v33, %v941_v34 }
 0x1d5   : > { %v3055_v62 = vpop.eup %3054  ;;  %1370 = vmatprep.mubr.bf16.mxu0 %v1142_v18  ;;  %1666 = vmatprep.mubr.bf16.mxu1 %v1142_v18  ;;  %v944_v35 = vmul.f32 %v3053_v15, %v3935_v29  ;;  %v943_v13 = vmul.f32 %v3053_v15, %v3932_v28 }
 0x1d6   : > { %v946_v45 = vmul.f32 %v3055_v62, %v3945_v31  ;;  %v1092_v26 = vadd.f32 %v4059_v43, %v1017_v44  ;;  %v1091_v57 = vadd.f32 %v4067_v21, %v1016_v3  ;;  %v945_v2 = vmul.f32 %v3055_v62, %v3942_v39 }
 0x1d7   : > { %v1019_v25 = vmul.f32 %v4050_v47, %v944_v35  ;;  %v1018_v36 = vmul.f32 %v4048_v33, %v943_v13 }
 0x1d8   : > { %v3057_v24 = vpop.eup %3056  ;;  %v1021_v49 = vmul.f32 %v4050_v47, %v946_v45  ;;  %1371 = vmatmul.mubr.bf16.gmra.mxu0 %v1141_v60  ;;  %v1020_v15 = vmul.f32 %v4048_v33, %v945_v2 }
 0x1d9   : > { %1667 = vmatmul.mubr.bf16.gmra.mxu1 %v1141_v60  ;;  %v1094_v29 = vadd.f32 %v4059_v43, %v1019_v25  ;;  %v1093_v28 = vadd.f32 %v4067_v21, %v1018_v36  ;;  %v948_v48 = vmul.f32 %v3057_v24, %v3961_v40  ;;  %v3059_v31 = vpop.eup %3058  ;;  %v947_v38 = vmul.f32 %v3057_v24, %v3958_v19 }
 0x1da   : > { %v1096_v27 = vadd.f32 %v4059_v43, %v1021_v49  ;;  %v950_v54 = vmul.f32 %v3059_v31, %v3969_v9  ;;  %v1095_v35 = vadd.f32 %v4067_v21, %v1020_v15  ;;  %v949_v13 = vmul.f32 %v3059_v31, %v3966_v37 }
 0x1db   : > { %v1144_v56 = vpack.c.bf16 %v1094_v29, %v1092_v26  ;;  %v1023_v63 = vmul.f32 %v4050_v47, %v948_v48  ;;  %v1143_v6 = vpack.c.bf16 %v1093_v28, %v1091_v57  ;;  %v1022_v4 = vmul.f32 %v4048_v33, %v947_v38 }
 0x1dc   : > { %v3061_v7 = vpop.eup %3060  ;;  %v1025_v39 = vmul.f32 %v4050_v47, %v950_v54 }
 0x1dd   : > { %1378 = vmatprep.mubr.bf16.mxu0 %v1144_v56  ;;  %1674 = vmatprep.mubr.bf16.mxu1 %v1144_v56  ;;  %v1098_v16 = vadd.f32 %v4059_v43, %v1023_v63  ;;  %v952_v40 = vmul.f32 %v3061_v7, %v3985_v23  ;;  %v1097_v62 = vadd.f32 %v4067_v21, %v1022_v4 }
 0x1de   : > { %v951_v23 = vmul.f32 %v3061_v7, %v3978_v46  ;;  %v1100_v45 = vadd.f32 %v4059_v43, %v1025_v39  ;;  %v1024_v46 = vmul.f32 %v4048_v33, %v949_v13 }
 0x1df   : > { %v1146_v18 = vpack.c.bf16 %v1098_v16, %v1096_v27  ;;  %v1027_v34 = vmul.f32 %v4050_v47, %v952_v40  ;;  %v1145_v3 = vpack.c.bf16 %v1097_v62, %v1095_v35 }
 0x1e0   : > { %v3063_v19 = vpop.eup %3062  ;;  %1379 = vmatmul.mubr.bf16.gmra.mxu0 %v1143_v6  ;;  %v1026_v36 = vmul.f32 %v4048_v33, %v951_v23  ;;  %v1099_v29 = vadd.f32 %v4067_v21, %v1024_v46 }
 0x1e1   : > { %1675 = vmatmul.mubr.bf16.gmra.mxu1 %v1143_v6  ;;  %1386 = vmatprep.mubr.bf16.mxu0 %v1146_v18  ;;  %v3065_v44 = vpop.eup %3064  ;;  %v1102_v9 = vadd.f32 %v4059_v43, %v1027_v34  ;;  %v956_v60 = vmul.f32 %v3063_v19, %v4005_v52  ;;  %v955_v49 = vmul.f32 %v3063_v19, %v3998_v51 }
 0x1e2   : > { %1682 = vmatprep.mubr.bf16.mxu1 %v1146_v18  ;;  %v954_v25 = vmul.f32 %v3065_v44, %v3995_v32  ;;  %v1101_v37 = vadd.f32 %v4067_v21, %v1026_v36  ;;  %v953_v28 = vmul.f32 %v3065_v44, %v3992_v50 }
 0x1e3   : > { %v1148_v24 = vpack.c.bf16 %v1102_v9, %v1100_v45  ;;  %v1031_v26 = vmul.f32 %v4050_v47, %v956_v60  ;;  %v1030_v56 = vmul.f32 %v4048_v33, %v955_v49 }
 0x1e4   : > { %v1029_v52 = vmul.f32 %v4050_v47, %v954_v25  ;;  %v1147_v31 = vpack.c.bf16 %v1101_v37, %v1099_v29  ;;  %v1028_v63 = vmul.f32 %v4048_v33, %v953_v28 }
 0x1e5   : > { %v1106_v32 = vadd.f32 %v4059_v43, %v1031_v26  ;;  %v1105_v51 = vadd.f32 %v4067_v21, %v1030_v56  ;;  %v4659_v26 = vld [vmem:[#allocation42_spill] sm:$0xff] }
 0x1e6   : > { %v1104_v48 = vadd.f32 %v4059_v43, %v1029_v52  ;;  %v1103_v38 = vadd.f32 %v4067_v21, %v1028_v63  ;;  %v4661_v63 = vld [vmem:[#allocation43_spill] sm:$0xff] }
 0x1e8   : > { %1387 = vmatmul.mubr.bf16.gmra.mxu0 %v1145_v3  ;;  %v1150_v57 = vpack.c.bf16 %v1106_v32, %v1104_v48  ;;  %v1149_v7 = vpack.c.bf16 %v1105_v51, %v1103_v38 }
 0x1e9   : > { %1683 = vmatmul.mubr.bf16.gmra.mxu1 %v1145_v3  ;;  %1394 = vmatprep.mubr.bf16.mxu0 %v1148_v24 }
 0x1ea   : > { %1690 = vmatprep.mubr.bf16.mxu1 %v1148_v24 }
 0x1f0   : > { %1395 = vmatmul.mubr.bf16.gmra.mxu0 %v1147_v31 }
 0x1f1   : > { %1691 = vmatmul.mubr.bf16.gmra.mxu1 %v1147_v31  ;;  %1402 = vmatprep.mubr.bf16.mxu0 %v1150_v57 }
 0x1f2   : > { %1698 = vmatprep.mubr.bf16.mxu1 %v1150_v57 }
 0x1f8   : > { %1403 = vmatmul.mubr.bf16.gmra.mxu0 %v1149_v7 }
 0x1f9   : > { %1699 = vmatmul.mubr.bf16.gmra.mxu1 %v1149_v7 }
 0x225   : > { %v787_v50 = vpop.xlane.xlu0 %786 }
 0x226   : > { %v841_v27 = vmul.f32 0.00390625, %v787_v50 }
 0x228   : > { %v873_v2 = vadd.f32 1e-05, %v841_v27  ;;  %v790_v6 = vpop.xlane.xlu1 %789 }
 0x229   : > { %v842_v16 = vmul.f32 0.00390625, %v790_v6 }
 0x22a   : > { %3066 = vrsqrt.f32 %v873_v2 }
 0x22b   : > { %v874_v40 = vadd.f32 1e-05, %v842_v16 }
 0x22d   : > { %v793_v54 = vpop.xlane.xlu0 %792  ;;  %3068 = vrsqrt.f32 %v874_v40 }
 0x22e   : > { %v843_v18 = vmul.f32 0.00390625, %v793_v54 }
 0x230   : > { %v875_v4 = vadd.f32 1e-05, %v843_v18  ;;  %v796_v34 = vpop.xlane.xlu1 %795 }
 0x231   : > { %v844_v19 = vmul.f32 0.00390625, %v796_v34 }
 0x232   : > { %3070 = vrsqrt.f32 %v875_v4 }
 0x233   : > { %v876_v15 = vadd.f32 1e-05, %v844_v19 }
 0x235   : > { %v799_v39 = vpop.xlane.xlu0 %798  ;;  %3072 = vrsqrt.f32 %v876_v15 }
 0x236   : > { %v845_v44 = vmul.f32 0.00390625, %v799_v39 }
 0x237   : > { %v3067_v62 = vpop.eup %3066 }
 0x238   : > { %v877_v23 = vadd.f32 1e-05, %v845_v44  ;;  %v958_v9 = vmul.f32 %v3067_v62, %v4019_v41  ;;  %v957_v60 = vmul.f32 %v3067_v62, %v4016_v61 }
 0x239   : > { %v802_v35 = vpop.xlane.xlu1 %801 }
 0x23a   : > { %3074 = vrsqrt.f32 %v877_v23  ;;  %v846_v13 = vmul.f32 0.00390625, %v802_v35  ;;  %v3069_v45 = vpop.eup %3068  ;;  %v1033_v25 = vmul.f32 %v4050_v47, %v958_v9  ;;  %v1032_v3 = vmul.f32 %v4048_v33, %v957_v60 }
 0x23b   : > { %v960_v24 = vmul.f32 %v3069_v45, %v4029_v0  ;;  %v959_v46 = vmul.f32 %v3069_v45, %v4659_v26  ;;  %v4660_v0 = vld [vmem:[#allocation44_spill] sm:$0xff] }
 0x23c   : > { %v878_v36 = vadd.f32 1e-05, %v846_v13  ;;  %v1108_v32 = vadd.f32 %v4059_v43, %v1033_v25  ;;  %v1107_v29 = vadd.f32 %v4067_v21, %v1032_v3 }
 0x23d   : > { %v805_v52 = vpop.xlane.xlu0 %804  ;;  %v1035_v41 = vmul.f32 %v4050_v47, %v960_v24  ;;  %v1034_v61 = vmul.f32 %v4048_v33, %v959_v46 }
 0x23e   : > { %3076 = vrsqrt.f32 %v878_v36  ;;  %v847_v37 = vmul.f32 0.00390625, %v805_v52 }
 0x23f   : > { %v3071_v49 = vpop.eup %3070  ;;  %v1110_v48 = vadd.f32 %v4059_v43, %v1035_v41  ;;  %v1109_v31 = vadd.f32 %v4067_v21, %v1034_v61 }
 0x240   : > { %v879_v28 = vadd.f32 1e-05, %v847_v37  ;;  %v962_v56 = vmul.f32 %v3071_v49, %v4660_v0  ;;  %v961_v51 = vmul.f32 %v3071_v49, %v4661_v63 }
 0x241   : > { %v808_v57 = vpop.xlane.xlu1 %807  ;;  %v1152_v7 = vpack.c.bf16 %v1110_v48, %v1108_v32  ;;  %v1151_v50 = vpack.c.bf16 %v1109_v31, %v1107_v29 }
 0x242   : > { %3078 = vrsqrt.f32 %v879_v28  ;;  %v848_v38 = vmul.f32 0.00390625, %v808_v57  ;;  %v3073_v27 = vpop.eup %3072  ;;  %v1037_v2 = vmul.f32 %v4050_v47, %v962_v56  ;;  %v1036_v6 = vmul.f32 %v4048_v33, %v961_v51 }
 0x243   : > { %1410 = vmatprep.mubr.bf16.mxu0 %v1152_v7  ;;  %1706 = vmatprep.mubr.bf16.mxu1 %v1152_v7  ;;  %v964_v40 = vmul.f32 %v3073_v27, %v4056_v8  ;;  %v963_v54 = vmul.f32 %v3073_v27, %v4053_v20 }
 0x244   : > { %v880_v16 = vadd.f32 1e-05, %v848_v38  ;;  %1411 = vmatmul.mubr.bf16.gmra.mxu0 %v1151_v50  ;;  %1707 = vmatmul.mubr.bf16.gmra.mxu1 %v1151_v50  ;;  %v1112_v39 = vadd.f32 %v4059_v43, %v1037_v2  ;;  %v1111_v44 = vadd.f32 %v4067_v21, %v1036_v6 }
 0x245   : > { %v811_v18 = vpop.xlane.xlu0 %810  ;;  %v1039_v34 = vmul.f32 %v4050_v47, %v964_v40  ;;  %v1038_v19 = vmul.f32 %v4048_v33, %v963_v54 }
 0x246   : > { %3080 = vrsqrt.f32 %v880_v16  ;;  %v849_v4 = vmul.f32 0.00390625, %v811_v18 }
 0x247   : > { %v3075_v15 = vpop.eup %3074  ;;  %v1114_v23 = vadd.f32 %v4059_v43, %v1039_v34  ;;  %v1113_v8 = vadd.f32 %v4067_v21, %v1038_v19 }
 0x248   : > { %v881_v62 = vadd.f32 1e-05, %v849_v4  ;;  %v966_v20 = vmul.f32 %v3075_v15, %v4074_v14  ;;  %v965_v9 = vmul.f32 %v3075_v15, %v4071_v10 }
 0x249   : > { %v814_v60 = vpop.xlane.xlu1 %813  ;;  %v1154_v35 = vpack.c.bf16 %v1114_v23, %v1112_v39  ;;  %v1153_v13 = vpack.c.bf16 %v1113_v8, %v1111_v44  ;;  %v4662_v23 = vld [vmem:[#allocation23_spill] sm:$0xff] }
 0x24a   : > { %3082 = vrsqrt.f32 %v881_v62  ;;  %v850_v25 = vmul.f32 0.00390625, %v814_v60  ;;  %v1041_v3 = vmul.f32 %v4050_v47, %v966_v20  ;;  %v1040_v36 = vmul.f32 %v4048_v33, %v965_v9 }
 0x24b   : > { %v3077_v45 = vpop.eup %3076  ;;  %1418 = vmatprep.mubr.bf16.mxu0 %v1154_v35  ;;  %1714 = vmatprep.mubr.bf16.mxu1 %v1154_v35 }
 0x24c   : > { %v968_v24 = vmul.f32 %v3077_v45, %v4090_v5  ;;  %v967_v26 = vmul.f32 %v3077_v45, %v4087_v53  ;;  %v882_v46 = vadd.f32 1e-05, %v850_v25  ;;  %1419 = vmatmul.mubr.bf16.gmra.mxu0 %v1153_v13  ;;  %1715 = vmatmul.mubr.bf16.gmra.mxu1 %v1153_v13  ;;  %v1116_v61 = vadd.f32 %v4059_v43, %v1041_v3  ;;  %v4663_v3 = vld [vmem:[#allocation36_spill] sm:$0xff] }
 0x24d   : > { %v817_v10 = vpop.xlane.xlu0 %816  ;;  %v1115_v49 = vadd.f32 %v4067_v21, %v1040_v36 }
 0x24e   : > { %v851_v14 = vmul.f32 0.00390625, %v817_v10  ;;  %v1043_v52 = vmul.f32 %v4050_v47, %v968_v24  ;;  %v1042_v37 = vmul.f32 %v4048_v33, %v967_v26  ;;  %3084 = vrsqrt.f32 %v882_v46 }
 0x24f   : > { %v3079_v41 = vpop.eup %3078 }
 0x250   : > { %v883_v32 = vadd.f32 1e-05, %v851_v14  ;;  %v1118_v5 = vadd.f32 %v4059_v43, %v1043_v52  ;;  %v1117_v53 = vadd.f32 %v4067_v21, %v1042_v37  ;;  %v970_v29 = vmul.f32 %v3079_v41, %v4105_v17 }
 0x251   : > { %v820_v28 = vpop.xlane.xlu1 %819  ;;  %v969_v48 = vmul.f32 %v3079_v41, %v4102_v58 }
 0x252   : > { %3086 = vrsqrt.f32 %v883_v32  ;;  %v852_v31 = vmul.f32 0.00390625, %v820_v28  ;;  %v1156_v0 = vpack.c.bf16 %v1118_v5, %v1116_v61  ;;  %v1155_v56 = vpack.c.bf16 %v1117_v53, %v1115_v49 }
 0x253   : > { %v3081_v57 = vpop.eup %3080  ;;  %v1045_v63 = vmul.f32 %v4050_v47, %v970_v29  ;;  %v1044_v50 = vmul.f32 %v4048_v33, %v969_v48 }
 0x254   : > { %v884_v51 = vadd.f32 1e-05, %v852_v31  ;;  %1426 = vmatprep.mubr.bf16.mxu0 %v1156_v0  ;;  %1722 = vmatprep.mubr.bf16.mxu1 %v1156_v0  ;;  %v972_v38 = vmul.f32 %v3081_v57, %v4121_v42  ;;  %v971_v7 = vmul.f32 %v3081_v57, %v4118_v12 }
 0x255   : > { %1427 = vmatmul.mubr.bf16.gmra.mxu0 %v1155_v56  ;;  %1723 = vmatmul.mubr.bf16.gmra.mxu1 %v1155_v56  ;;  %v1120_v2 = vadd.f32 %v4059_v43, %v1045_v63  ;;  %v1119_v16 = vadd.f32 %v4067_v21, %v1044_v50 }
 0x256   : > { %3088 = vrsqrt.f32 %v884_v51  ;;  %v1047_v58 = vmul.f32 %v4050_v47, %v972_v38  ;;  %v1046_v17 = vmul.f32 %v4048_v33, %v971_v7 }
 0x257   : > { %v3083_v27 = vpop.eup %3082 }
 0x258   : > { %v1122_v6 = vadd.f32 %v4059_v43, %v1047_v58  ;;  %v1121_v42 = vadd.f32 %v4067_v21, %v1046_v17  ;;  %v974_v12 = vmul.f32 %v3083_v27, %v4136_v30  ;;  %v973_v40 = vmul.f32 %v3083_v27, %v4133_v1 }
 0x25a   : > { %v1158_v54 = vpack.c.bf16 %v1122_v6, %v1120_v2  ;;  %v1157_v18 = vpack.c.bf16 %v1121_v42, %v1119_v16  ;;  %v1049_v34 = vmul.f32 %v4050_v47, %v974_v12  ;;  %v1048_v39 = vmul.f32 %v4048_v33, %v973_v40 }
 0x25b   : > { %v3085_v4 = vpop.eup %3084 }
 0x25c   : > { %1434 = vmatprep.mubr.bf16.mxu0 %v1158_v54  ;;  %1730 = vmatprep.mubr.bf16.mxu1 %v1158_v54  ;;  %v976_v19 = vmul.f32 %v3085_v4, %v4152_v59  ;;  %v975_v15 = vmul.f32 %v3085_v4, %v4149_v11  ;;  %v1124_v20 = vadd.f32 %v4059_v43, %v1049_v34 }
 0x25d   : > { %1435 = vmatmul.mubr.bf16.gmra.mxu0 %v1157_v18  ;;  %1731 = vmatmul.mubr.bf16.gmra.mxu1 %v1157_v18  ;;  %v1123_v60 = vadd.f32 %v4067_v21, %v1048_v39 }
 0x25e   : > { %v1051_v30 = vmul.f32 %v4050_v47, %v976_v19  ;;  %v1050_v1 = vmul.f32 %v4048_v33, %v975_v15 }
 0x25f   : > { %v3087_v44 = vpop.eup %3086 }
 0x260   : > { %v978_v62 = vmul.f32 %v3087_v44, %v4168_v55  ;;  %v977_v8 = vmul.f32 %v3087_v44, %v4662_v23  ;;  %v1126_v9 = vadd.f32 %v4059_v43, %v1051_v30  ;;  %v1125_v59 = vadd.f32 %v4067_v21, %v1050_v1 }
 0x262   : > { %v1160_v35 = vpack.c.bf16 %v1126_v9, %v1124_v20  ;;  %v1159_v13 = vpack.c.bf16 %v1125_v59, %v1123_v60  ;;  %v1053_v25 = vmul.f32 %v4050_v47, %v978_v62  ;;  %v1052_v55 = vmul.f32 %v4048_v33, %v977_v8 }
 0x263   : > { %v3089_v11 = vpop.eup %3088 }
 0x264   : > { %v980_v45 = vmul.f32 %v3089_v11, %v4182_v22  ;;  %v979_v36 = vmul.f32 %v3089_v11, %v4663_v3  ;;  %1442 = vmatprep.mubr.bf16.mxu0 %v1160_v35  ;;  %1738 = vmatprep.mubr.bf16.mxu1 %v1160_v35  ;;  %v1128_v46 = vadd.f32 %v4059_v43, %v1053_v25 }
 0x265   : > { %1443 = vmatmul.mubr.bf16.gmra.mxu0 %v1159_v13  ;;  %1739 = vmatmul.mubr.bf16.gmra.mxu1 %v1159_v13  ;;  %v1127_v22 = vadd.f32 %v4067_v21, %v1052_v55 }
 0x266   : > { %v1055_v24 = vmul.f32 %v4050_v47, %v980_v45  ;;  %v1054_v26 = vmul.f32 %v4048_v33, %v979_v36 }
 0x268   : > { %v1130_v10 = vadd.f32 %v4059_v43, %v1055_v24  ;;  %v1129_v14 = vadd.f32 %v4067_v21, %v1054_v26  ;;  %v4341_v43 = vld [vmem:[%s4549_s4] ss:$0 sm:$0xff] }
 0x269   : > { %v4346_v21 = vld [vmem:[%s4551_s6] ss:$0 sm:$0xff] }
 0x26a   : > { %v1162_v52 = vpack.c.bf16 %v1130_v10, %v1128_v46  ;;  %v1161_v37 = vpack.c.bf16 %v1129_v14, %v1127_v22 }
 0x26c   : > { %1450 = vmatprep.mubr.bf16.mxu0 %v1162_v52  ;;  %1746 = vmatprep.mubr.bf16.mxu1 %v1162_v52 }
 0x26d   : > { %1451 = vmatmul.mubr.bf16.gmra.mxu0 %v1161_v37  ;;  %1747 = vmatmul.mubr.bf16.gmra.mxu1 %v1161_v37 }
 0x26e   : > { %v2666_v41 = vpop.f32.mrf.mxu0 }
 0x26f   : > { %v2778_v61 = vpop.f32.mrf.mxu1 }
 0x270   : > { %v2667_v47 = vpop.f32.mrf.mxu0 }
 0x271   : > { %v2779_v49 = vpop.f32.mrf.mxu1  ;;  %v2668_v5 = vadd.f32 %v2667_v47, %v2666_v41 }
 0x272   : > { %v2669_v33 = vpop.f32.mrf.mxu0  ;;  %v2780_v53 = vadd.f32 %v2779_v49, %v2778_v61 }
 0x273   : > { %v2781_v32 = vpop.f32.mrf.mxu1  ;;  %v1333_v57 = vadd.f32 %v2668_v5, %v4341_v43 }
 0x274   : > { %v2670_v29 = vpop.f32.mrf.mxu0  ;;  %v1629_v63 = vadd.f32 %v2780_v53, %v4346_v21 }
 0x275   : > { %v2782_v28 = vpop.f32.mrf.mxu1  ;;  %v2671_v48 = vadd.f32 %v2670_v29, %v2669_v33 }
 0x276   : > { %v2783_v31 = vadd.f32 %v2782_v28, %v2781_v32  ;;  %v2672_v0 = vpop.f32.mrf.mxu0 }
 0x277   : > { %v2784_v56 = vpop.f32.mrf.mxu1  ;;  %v1336_v51 = vadd.f32 %v2671_v48, %v4341_v43 }
 0x278   : > { %v1632_v38 = vadd.f32 %v2783_v31, %v4346_v21  ;;  %v2673_v7 = vpop.f32.mrf.mxu0 }
 0x279   : > { %v2785_v50 = vpop.f32.mrf.mxu1  ;;  %v2463_v58 = vpack.c.bf16 %v1336_v51, %v1333_v57  ;;  %v2674_v6 = vadd.f32 %v2673_v7, %v2672_v0 }
 0x27a   : > { %v2543_v17 = vpack.c.bf16 %v1632_v38, %v1629_v63  ;;  %v2675_v27 = vpop.f32.mrf.mxu0  ;;  %v2786_v16 = vadd.f32 %v2785_v50, %v2784_v56 }
 0x27b   : > { %v2787_v2 = vpop.f32.mrf.mxu1  ;;  %2464 = vst [vmem:[%s4353_s14] sm:$0xff] %v2463_v58   ;;  %v1341_v18 = vadd.f32 %v2674_v6, %v4341_v43 }
 0x27c   : > { %2544 = vst [vmem:[%s4356_s20] sm:$0xff] %v2543_v17   ;;  %v2676_v42 = vpop.f32.mrf.mxu0  ;;  %v1637_v4 = vadd.f32 %v2786_v16, %v4346_v21 }
 0x27d   : > { %v2788_v12 = vpop.f32.mrf.mxu1  ;;  %v2677_v40 = vadd.f32 %v2676_v42, %v2675_v27 }
 0x27e   : > { %v2789_v54 = vadd.f32 %v2788_v12, %v2787_v2 }
 0x27f   : > { %v1344_v34 = vadd.f32 %v2677_v40, %v4341_v43  ;;  %v2678_v15 = vpop.f32.mrf.mxu0  ;;  %v2790_v39 = vpop.f32.mrf.mxu1 }
 0x280   : > { %v1640_v19 = vadd.f32 %v2789_v54, %v4346_v21 }
 0x281   : > { %v2468_v44 = vpack.c.bf16 %v1344_v34, %v1341_v18  ;;  %v2679_v1 = vpop.f32.mrf.mxu0  ;;  %v2791_v62 = vpop.f32.mrf.mxu1 }
 0x282   : > { %v2548_v30 = vpack.c.bf16 %v1640_v19, %v1637_v4  ;;  %v2680_v20 = vadd.f32 %v2679_v1, %v2678_v15  ;;  %v2792_v9 = vadd.f32 %v2791_v62, %v2790_v39 }
 0x283   : > { %2620 = vst [vmem:[%s4353_s14 + $0x8] sm:$0xff] %v2468_v44   ;;  %v2681_v23 = vpop.f32.mrf.mxu0  ;;  %v2793_v8 = vpop.f32.mrf.mxu1 }
 0x284   : > { %2635 = vst [vmem:[%s4356_s20 + $0x8] sm:$0xff] %v2548_v30   ;;  %v1349_v13 = vadd.f32 %v2680_v20, %v4341_v43  ;;  %v1645_v45 = vadd.f32 %v2792_v9, %v4346_v21 }
 0x285   : > { %v2682_v60 = vpop.f32.mrf.mxu0  ;;  %v2794_v59 = vpop.f32.mrf.mxu1 }
 0x286   : > { %v2683_v11 = vadd.f32 %v2682_v60, %v2681_v23  ;;  %v2795_v35 = vadd.f32 %v2794_v59, %v2793_v8 }
 0x288   : > { %v1352_v25 = vadd.f32 %v2683_v11, %v4341_v43  ;;  %v1648_v3 = vadd.f32 %v2795_v35, %v4346_v21  ;;  %v2684_v36 = vpop.f32.mrf.mxu0 }
 0x289   : > { %v2796_v55 = vpop.f32.mrf.mxu1 }
 0x28a   : > { %v2473_v24 = vpack.c.bf16 %v1352_v25, %v1349_v13  ;;  %v2553_v26 = vpack.c.bf16 %v1648_v3, %v1645_v45  ;;  %v2685_v46 = vpop.f32.mrf.mxu0 }
 0x28b   : > { %v2797_v10 = vpop.f32.mrf.mxu1  ;;  %v2686_v52 = vadd.f32 %v2685_v46, %v2684_v36 }
 0x28c   : > { %2621 = vst [vmem:[%s4353_s14 + $0x10] sm:$0xff] %v2473_v24   ;;  %2636 = vst [vmem:[%s4356_s20 + $0x10] sm:$0xff] %v2553_v26   ;;  %v2687_v22 = vpop.f32.mrf.mxu0  ;;  %v2798_v37 = vadd.f32 %v2797_v10, %v2796_v55 }
 0x28d   : > { %v2799_v14 = vpop.f32.mrf.mxu1  ;;  %v1357_v5 = vadd.f32 %v2686_v52, %v4341_v43 }
 0x28e   : > { %v2688_v41 = vpop.f32.mrf.mxu0  ;;  %v1653_v53 = vadd.f32 %v2798_v37, %v4346_v21 }
 0x28f   : > { %v2800_v61 = vpop.f32.mrf.mxu1  ;;  %v2689_v47 = vadd.f32 %v2688_v41, %v2687_v22 }
 0x290   : > { %v2801_v49 = vadd.f32 %v2800_v61, %v2799_v14  ;;  %v2690_v33 = vpop.f32.mrf.mxu0 }
 0x291   : > { %v2802_v32 = vpop.f32.mrf.mxu1  ;;  %v1360_v29 = vadd.f32 %v2689_v47, %v4341_v43 }
 0x292   : > { %v1656_v28 = vadd.f32 %v2801_v49, %v4346_v21  ;;  %v2691_v48 = vpop.f32.mrf.mxu0 }
 0x293   : > { %v2803_v31 = vpop.f32.mrf.mxu1  ;;  %v2478_v0 = vpack.c.bf16 %v1360_v29, %v1357_v5  ;;  %v2692_v51 = vadd.f32 %v2691_v48, %v2690_v33 }
 0x294   : > { %v2558_v56 = vpack.c.bf16 %v1656_v28, %v1653_v53  ;;  %v2693_v57 = vpop.f32.mrf.mxu0  ;;  %v2804_v38 = vadd.f32 %v2803_v31, %v2802_v32 }
 0x295   : > { %v2805_v63 = vpop.f32.mrf.mxu1  ;;  %2622 = vst [vmem:[%s4353_s14 + $0x18] sm:$0xff] %v2478_v0   ;;  %v1365_v6 = vadd.f32 %v2692_v51, %v4341_v43 }
 0x296   : > { %2637 = vst [vmem:[%s4356_s20 + $0x18] sm:$0xff] %v2558_v56   ;;  %v2694_v7 = vpop.f32.mrf.mxu0  ;;  %v1661_v16 = vadd.f32 %v2804_v38, %v4346_v21 }
 0x297   : > { %v2806_v50 = vpop.f32.mrf.mxu1  ;;  %v2695_v58 = vadd.f32 %v2694_v7, %v2693_v57 }
 0x298   : > { %v2807_v17 = vadd.f32 %v2806_v50, %v2805_v63  ;;  %v2696_v27 = vpop.f32.mrf.mxu0 }
 0x299   : > { %v2808_v2 = vpop.f32.mrf.mxu1  ;;  %v1368_v42 = vadd.f32 %v2695_v58, %v4341_v43 }
 0x29a   : > { %v1664_v12 = vadd.f32 %v2807_v17, %v4346_v21  ;;  %v2697_v40 = vpop.f32.mrf.mxu0 }
 0x29b   : > { %v2809_v54 = vpop.f32.mrf.mxu1  ;;  %v2483_v18 = vpack.c.bf16 %v1368_v42, %v1365_v6  ;;  %v2698_v15 = vadd.f32 %v2697_v40, %v2696_v27 }
 0x29c   : > { %v2563_v4 = vpack.c.bf16 %v1664_v12, %v1661_v16  ;;  %v2699_v34 = vpop.f32.mrf.mxu0  ;;  %v2810_v39 = vadd.f32 %v2809_v54, %v2808_v2 }
 0x29d   : > { %v2811_v19 = vpop.f32.mrf.mxu1  ;;  %2623 = vst [vmem:[%s4353_s14 + $0x20] sm:$0xff] %v2483_v18   ;;  %v1373_v20 = vadd.f32 %v2698_v15, %v4341_v43 }
 0x29e   : > { %2638 = vst [vmem:[%s4356_s20 + $0x20] sm:$0xff] %v2563_v4   ;;  %v2700_v44 = vpop.f32.mrf.mxu0  ;;  %v1669_v9 = vadd.f32 %v2810_v39, %v4346_v21 }
 0x29f   : > { %v2812_v30 = vpop.f32.mrf.mxu1  ;;  %v2701_v1 = vadd.f32 %v2700_v44, %v2699_v34 }
 0x2a0   : > { %v2813_v62 = vadd.f32 %v2812_v30, %v2811_v19  ;;  %v2702_v23 = vpop.f32.mrf.mxu0 }
 0x2a1   : > { %v2814_v8 = vpop.f32.mrf.mxu1  ;;  %v1376_v60 = vadd.f32 %v2701_v1, %v4341_v43 }
 0x2a2   : > { %v1672_v59 = vadd.f32 %v2813_v62, %v4346_v21  ;;  %v2703_v11 = vpop.f32.mrf.mxu0 }
 0x2a3   : > { %v2815_v35 = vpop.f32.mrf.mxu1  ;;  %v2488_v13 = vpack.c.bf16 %v1376_v60, %v1373_v20  ;;  %v2704_v36 = vadd.f32 %v2703_v11, %v2702_v23 }
 0x2a4   : > { %v2568_v45 = vpack.c.bf16 %v1672_v59, %v1669_v9  ;;  %v2705_v25 = vpop.f32.mrf.mxu0  ;;  %v2816_v55 = vadd.f32 %v2815_v35, %v2814_v8 }
 0x2a5   : > { %v2817_v3 = vpop.f32.mrf.mxu1  ;;  %2624 = vst [vmem:[%s4353_s14 + $0x28] sm:$0xff] %v2488_v13   ;;  %v1381_v52 = vadd.f32 %v2704_v36, %v4341_v43 }
 0x2a6   : > { %2639 = vst [vmem:[%s4356_s20 + $0x28] sm:$0xff] %v2568_v45   ;;  %v2706_v24 = vpop.f32.mrf.mxu0  ;;  %v1677_v37 = vadd.f32 %v2816_v55, %v4346_v21 }
 0x2a7   : > { %v2818_v26 = vpop.f32.mrf.mxu1  ;;  %v2707_v46 = vadd.f32 %v2706_v24, %v2705_v25 }
 0x2a8   : > { %v2819_v10 = vadd.f32 %v2818_v26, %v2817_v3  ;;  %v2708_v22 = vpop.f32.mrf.mxu0 }
 0x2a9   : > { %v2820_v14 = vpop.f32.mrf.mxu1  ;;  %v1384_v41 = vadd.f32 %v2707_v46, %v4341_v43 }
 0x2aa   : > { %v1680_v61 = vadd.f32 %v2819_v10, %v4346_v21  ;;  %v2709_v47 = vpop.f32.mrf.mxu0 }
 0x2ab   : > { %v2821_v49 = vpop.f32.mrf.mxu1  ;;  %v2493_v33 = vpack.c.bf16 %v1384_v41, %v1381_v52  ;;  %v2710_v29 = vadd.f32 %v2709_v47, %v2708_v22 }
 0x2ac   : > { %v2573_v32 = vpack.c.bf16 %v1680_v61, %v1677_v37  ;;  %v2711_v5 = vpop.f32.mrf.mxu0  ;;  %v2822_v28 = vadd.f32 %v2821_v49, %v2820_v14 }
 0x2ad   : > { %v2823_v53 = vpop.f32.mrf.mxu1  ;;  %2625 = vst [vmem:[%s4353_s14 + $0x30] sm:$0xff] %v2493_v33   ;;  %v1389_v51 = vadd.f32 %v2710_v29, %v4341_v43 }
 0x2ae   : > { %2640 = vst [vmem:[%s4356_s20 + $0x30] sm:$0xff] %v2573_v32   ;;  %v2712_v48 = vpop.f32.mrf.mxu0  ;;  %v1685_v38 = vadd.f32 %v2822_v28, %v4346_v21 }
 0x2af   : > { %v2824_v31 = vpop.f32.mrf.mxu1  ;;  %v2713_v0 = vadd.f32 %v2712_v48, %v2711_v5 }
 0x2b0   : > { %v2825_v56 = vadd.f32 %v2824_v31, %v2823_v53  ;;  %v2714_v57 = vpop.f32.mrf.mxu0 }
 0x2b1   : > { %v2826_v63 = vpop.f32.mrf.mxu1  ;;  %v1392_v7 = vadd.f32 %v2713_v0, %v4341_v43 }
 0x2b2   : > { %v1688_v50 = vadd.f32 %v2825_v56, %v4346_v21  ;;  %v2715_v58 = vpop.f32.mrf.mxu0 }
 0x2b3   : > { %v2827_v17 = vpop.f32.mrf.mxu1  ;;  %v2498_v27 = vpack.c.bf16 %v1392_v7, %v1389_v51  ;;  %v2716_v42 = vadd.f32 %v2715_v58, %v2714_v57 }
 0x2b4   : > { %v2578_v2 = vpack.c.bf16 %v1688_v50, %v1685_v38  ;;  %v2717_v6 = vpop.f32.mrf.mxu0  ;;  %v2828_v12 = vadd.f32 %v2827_v17, %v2826_v63 }
 0x2b5   : > { %v2829_v16 = vpop.f32.mrf.mxu1  ;;  %2626 = vst [vmem:[%s4353_s14 + $0x38] sm:$0xff] %v2498_v27   ;;  %v1397_v15 = vadd.f32 %v2716_v42, %v4341_v43 }
 0x2b6   : > { %2641 = vst [vmem:[%s4356_s20 + $0x38] sm:$0xff] %v2578_v2   ;;  %v2718_v40 = vpop.f32.mrf.mxu0  ;;  %v1693_v39 = vadd.f32 %v2828_v12, %v4346_v21 }
 0x2b7   : > { %v2830_v54 = vpop.f32.mrf.mxu1  ;;  %v2719_v18 = vadd.f32 %v2718_v40, %v2717_v6 }
 0x2b8   : > { %v2831_v4 = vadd.f32 %v2830_v54, %v2829_v16  ;;  %v2720_v34 = vpop.f32.mrf.mxu0 }
 0x2b9   : > { %v2832_v19 = vpop.f32.mrf.mxu1  ;;  %v1400_v44 = vadd.f32 %v2719_v18, %v4341_v43 }
 0x2ba   : > { %v1696_v30 = vadd.f32 %v2831_v4, %v4346_v21  ;;  %v2721_v1 = vpop.f32.mrf.mxu0 }
 0x2bb   : > { %v2833_v62 = vpop.f32.mrf.mxu1  ;;  %v2503_v23 = vpack.c.bf16 %v1400_v44, %v1397_v15  ;;  %v2722_v60 = vadd.f32 %v2721_v1, %v2720_v34 }
 0x2bc   : > { %v2583_v8 = vpack.c.bf16 %v1696_v30, %v1693_v39  ;;  %v2723_v20 = vpop.f32.mrf.mxu0  ;;  %v2834_v59 = vadd.f32 %v2833_v62, %v2832_v19 }
 0x2bd   : > { %v2835_v9 = vpop.f32.mrf.mxu1  ;;  %2627 = vst [vmem:[%s4353_s14 + $0x40] sm:$0xff] %v2503_v23   ;;  %v1405_v25 = vadd.f32 %v2722_v60, %v4341_v43 }
 0x2be   : > { %2642 = vst [vmem:[%s4356_s20 + $0x40] sm:$0xff] %v2583_v8   ;;  %v2724_v11 = vpop.f32.mrf.mxu0  ;;  %v1701_v3 = vadd.f32 %v2834_v59, %v4346_v21 }
 0x2bf   : > { %v2836_v35 = vpop.f32.mrf.mxu1  ;;  %v2725_v13 = vadd.f32 %v2724_v11, %v2723_v20 }
 0x2c0   : > { %v2837_v45 = vadd.f32 %v2836_v35, %v2835_v9 }
 0x2c1   : > { %v1408_v36 = vadd.f32 %v2725_v13, %v4341_v43 }
 0x2c2   : > { %v1704_v55 = vadd.f32 %v2837_v45, %v4346_v21 }
 0x2c3   : > { %v2508_v24 = vpack.c.bf16 %v1408_v36, %v1405_v25 }
 0x2c4   : > { %v2588_v26 = vpack.c.bf16 %v1704_v55, %v1701_v3 }
 0x2c5   : > { %2628 = vst [vmem:[%s4353_s14 + $0x48] sm:$0xff] %v2508_v24  }
 0x2c6   : > { %2643 = vst [vmem:[%s4356_s20 + $0x48] sm:$0xff] %v2588_v26  }
 0x304   : > { %v2726_v46 = vpop.f32.mrf.mxu0  ;;  %v2838_v10 = vpop.f32.mrf.mxu1 }
 0x306   : > { %v2727_v22 = vpop.f32.mrf.mxu0  ;;  %v2839_v14 = vpop.f32.mrf.mxu1 }
 0x307   : > { %v2728_v41 = vadd.f32 %v2727_v22, %v2726_v46  ;;  %v2840_v61 = vadd.f32 %v2839_v14, %v2838_v10 }
 0x308   : > { %v2729_v52 = vpop.f32.mrf.mxu0  ;;  %v2841_v37 = vpop.f32.mrf.mxu1 }
 0x309   : > { %v1413_v29 = vadd.f32 %v2728_v41, %v4341_v43  ;;  %v1709_v28 = vadd.f32 %v2840_v61, %v4346_v21 }
 0x30a   : > { %v2730_v47 = vpop.f32.mrf.mxu0  ;;  %v2842_v49 = vpop.f32.mrf.mxu1 }
 0x30b   : > { %v2731_v33 = vadd.f32 %v2730_v47, %v2729_v52  ;;  %v2843_v32 = vadd.f32 %v2842_v49, %v2841_v37 }
 0x30c   : > { %v2732_v5 = vpop.f32.mrf.mxu0  ;;  %v2844_v53 = vpop.f32.mrf.mxu1 }
 0x30d   : > { %v1416_v48 = vadd.f32 %v2731_v33, %v4341_v43  ;;  %v1712_v31 = vadd.f32 %v2843_v32, %v4346_v21 }
 0x30e   : > { %v2733_v0 = vpop.f32.mrf.mxu0  ;;  %v2845_v56 = vpop.f32.mrf.mxu1 }
 0x30f   : > { %v2513_v57 = vpack.c.bf16 %v1416_v48, %v1413_v29  ;;  %v2593_v63 = vpack.c.bf16 %v1712_v31, %v1709_v28  ;;  %v2734_v7 = vadd.f32 %v2733_v0, %v2732_v5  ;;  %v2846_v50 = vadd.f32 %v2845_v56, %v2844_v53 }
 0x310   : > { %v2735_v51 = vpop.f32.mrf.mxu0  ;;  %v2847_v38 = vpop.f32.mrf.mxu1 }
 0x311   : > { %2629 = vst [vmem:[%s4353_s14 + $0x50] sm:$0xff] %v2513_v57   ;;  %2644 = vst [vmem:[%s4356_s20 + $0x50] sm:$0xff] %v2593_v63   ;;  %v1421_v42 = vadd.f32 %v2734_v7, %v4341_v43  ;;  %v1717_v12 = vadd.f32 %v2846_v50, %v4346_v21 }
 0x312   : > { %v2736_v58 = vpop.f32.mrf.mxu0  ;;  %v2848_v17 = vpop.f32.mrf.mxu1 }
 0x313   : > { %v2737_v27 = vadd.f32 %v2736_v58, %v2735_v51  ;;  %v2849_v2 = vadd.f32 %v2848_v17, %v2847_v38 }
 0x315   : > { %v2738_v6 = vpop.f32.mrf.mxu0  ;;  %v2850_v16 = vpop.f32.mrf.mxu1  ;;  %v1424_v40 = vadd.f32 %v2737_v27, %v4341_v43  ;;  %v1720_v54 = vadd.f32 %v2849_v2, %v4346_v21 }
 0x317   : > { %v2739_v18 = vpop.f32.mrf.mxu0  ;;  %v2851_v4 = vpop.f32.mrf.mxu1  ;;  %v2518_v34 = vpack.c.bf16 %v1424_v40, %v1421_v42  ;;  %v2598_v19 = vpack.c.bf16 %v1720_v54, %v1717_v12 }
 0x318   : > { %v2740_v44 = vadd.f32 %v2739_v18, %v2738_v6  ;;  %v2852_v30 = vadd.f32 %v2851_v4, %v2850_v16 }
 0x319   : > { %v2741_v15 = vpop.f32.mrf.mxu0  ;;  %v2853_v39 = vpop.f32.mrf.mxu1  ;;  %2630 = vst [vmem:[%s4353_s14 + $0x58] sm:$0xff] %v2518_v34   ;;  %2645 = vst [vmem:[%s4356_s20 + $0x58] sm:$0xff] %v2598_v19  }
 0x31a   : > { %v1429_v60 = vadd.f32 %v2740_v44, %v4341_v43  ;;  %v1725_v59 = vadd.f32 %v2852_v30, %v4346_v21 }
 0x31b   : > { %v2742_v1 = vpop.f32.mrf.mxu0  ;;  %v2854_v62 = vpop.f32.mrf.mxu1 }
 0x31c   : > { %v2743_v23 = vadd.f32 %v2742_v1, %v2741_v15  ;;  %v2855_v8 = vadd.f32 %v2854_v62, %v2853_v39 }
 0x31d   : > { %v2744_v20 = vpop.f32.mrf.mxu0  ;;  %v2856_v9 = vpop.f32.mrf.mxu1 }
 0x31e   : > { %v1432_v11 = vadd.f32 %v2743_v23, %v4341_v43  ;;  %v1728_v35 = vadd.f32 %v2855_v8, %v4346_v21 }
 0x31f   : > { %v2745_v13 = vpop.f32.mrf.mxu0  ;;  %v2857_v45 = vpop.f32.mrf.mxu1 }
 0x320   : > { %v2523_v25 = vpack.c.bf16 %v1432_v11, %v1429_v60  ;;  %v2603_v3 = vpack.c.bf16 %v1728_v35, %v1725_v59  ;;  %v2746_v24 = vadd.f32 %v2745_v13, %v2744_v20  ;;  %v2858_v26 = vadd.f32 %v2857_v45, %v2856_v9 }
 0x321   : > { %v2747_v36 = vpop.f32.mrf.mxu0  ;;  %v2859_v55 = vpop.f32.mrf.mxu1 }
 0x322   : > { %2631 = vst [vmem:[%s4353_s14 + $0x60] sm:$0xff] %v2523_v25   ;;  %2646 = vst [vmem:[%s4356_s20 + $0x60] sm:$0xff] %v2603_v3   ;;  %v1437_v52 = vadd.f32 %v2746_v24, %v4341_v43  ;;  %v1733_v37 = vadd.f32 %v2858_v26, %v4346_v21 }
 0x323   : > { %v2748_v46 = vpop.f32.mrf.mxu0  ;;  %v2860_v10 = vpop.f32.mrf.mxu1 }
 0x324   : > { %v2749_v22 = vadd.f32 %v2748_v46, %v2747_v36  ;;  %v2861_v14 = vadd.f32 %v2860_v10, %v2859_v55 }
 0x325   : > { %v2750_v47 = vpop.f32.mrf.mxu0  ;;  %v2862_v49 = vpop.f32.mrf.mxu1 }
 0x326   : > { %v1440_v41 = vadd.f32 %v2749_v22, %v4341_v43  ;;  %v1736_v61 = vadd.f32 %v2861_v14, %v4346_v21 }
 0x327   : > { %v2751_v5 = vpop.f32.mrf.mxu0  ;;  %v2863_v53 = vpop.f32.mrf.mxu1 }
 0x328   : > { %v2528_v33 = vpack.c.bf16 %v1440_v41, %v1437_v52  ;;  %v2608_v32 = vpack.c.bf16 %v1736_v61, %v1733_v37  ;;  %v2752_v48 = vadd.f32 %v2751_v5, %v2750_v47  ;;  %v2864_v31 = vadd.f32 %v2863_v53, %v2862_v49 }
 0x329   : > { %v2753_v29 = vpop.f32.mrf.mxu0  ;;  %v2865_v28 = vpop.f32.mrf.mxu1 }
 0x32a   : > { %2632 = vst [vmem:[%s4353_s14 + $0x68] sm:$0xff] %v2528_v33   ;;  %2647 = vst [vmem:[%s4356_s20 + $0x68] sm:$0xff] %v2608_v32   ;;  %v1445_v7 = vadd.f32 %v2752_v48, %v4341_v43  ;;  %v1741_v50 = vadd.f32 %v2864_v31, %v4346_v21 }
 0x32b   : > { %v2754_v0 = vpop.f32.mrf.mxu0  ;;  %v2866_v56 = vpop.f32.mrf.mxu1 }
 0x32c   : > { %v2755_v57 = vadd.f32 %v2754_v0, %v2753_v29  ;;  %v2867_v63 = vadd.f32 %v2866_v56, %v2865_v28 }
 0x32d   : > { %v2756_v51 = vpop.f32.mrf.mxu0  ;;  %v2868_v38 = vpop.f32.mrf.mxu1 }
 0x32e   : > { %v1448_v58 = vadd.f32 %v2755_v57, %v4341_v43  ;;  %v1744_v17 = vadd.f32 %v2867_v63, %v4346_v21 }
 0x32f   : > { %v2757_v27 = vpop.f32.mrf.mxu0  ;;  %v2869_v2 = vpop.f32.mrf.mxu1 }
 0x330   : > { %v2533_v6 = vpack.c.bf16 %v1448_v58, %v1445_v7  ;;  %v2613_v16 = vpack.c.bf16 %v1744_v17, %v1741_v50  ;;  %v2758_v40 = vadd.f32 %v2757_v27, %v2756_v51  ;;  %v2870_v54 = vadd.f32 %v2869_v2, %v2868_v38 }
 0x331   : > { %v2759_v42 = vpop.f32.mrf.mxu0  ;;  %v2871_v12 = vpop.f32.mrf.mxu1 }
 0x332   : > { %2633 = vst [vmem:[%s4353_s14 + $0x70] sm:$0xff] %v2533_v6   ;;  %2648 = vst [vmem:[%s4356_s20 + $0x70] sm:$0xff] %v2613_v16   ;;  %v1453_v15 = vadd.f32 %v2758_v40, %v4341_v43  ;;  %v1749_v39 = vadd.f32 %v2870_v54, %v4346_v21 }
 0x333   : > { %v2760_v18 = vpop.f32.mrf.mxu0  ;;  %v2872_v4 = vpop.f32.mrf.mxu1 }
 0x334   : > { %v2761_v34 = vadd.f32 %v2760_v18, %v2759_v42  ;;  %v2873_v19 = vadd.f32 %v2872_v4, %v2871_v12 }
 0x336   : > { %v1456_v44 = vadd.f32 %v2761_v34, %v4341_v43  ;;  %v1752_v30 = vadd.f32 %v2873_v19, %v4346_v21 }
 0x338   : > { %v2538_v1 = vpack.c.bf16 %v1456_v44, %v1453_v15  ;;  %v2618_v62 = vpack.c.bf16 %v1752_v30, %v1749_v39 }
 0x33a   : > { %2634 = vst [vmem:[%s4353_s14 + $0x78] sm:$0xff] %v2538_v1   ;;  %2649 = vst [vmem:[%s4356_s20 + $0x78] sm:$0xff] %v2618_v62  }
 0x33b   : > { %3209 = shalt.err (!%p3206_p8)
}
 0x33c   : > { %s3210_s14 = scalar_lea.hbm %s4456_s13, 2048  ;;  %s3214_s30 = scalar_lea.hbm %s4665_s25, 8192 }
 0x33d   : > { %p3211_p11 = scmp.ne.s32.totalorder %s4456_s13, %s3210_s14  ;;  %p3215_p12 = scmp.lt.s32.totalorder %s4456_s13, %s4665_s25 }
 0x33e   : > { %p3216_p10 = scmp.lt.s32.totalorder %s3214_s30, %s3210_s14 }
 0x33f   : > { %p3212_p7 = pnand %p3211_p11, %p3504_p13 }
 0x340   : > { %p3217_p0 = por %p3216_p10, %p3215_p12 }
 0x341   : > { %p3213_p9 = pneg %p3212_p7 }
 0x343   : > { %p3218_p1 = pnand %p3217_p0, %p3213_p9 }
 0x345   : > { %3221 = shalt.err (!%p3218_p1)
}
 0x346   : > { %s3341_s5 = smov 64   ;;  %s3342_s7 = smov 4  }
 0x347   : > { %2888 = dma.vmem_to_hbm [thread:$0]  (%p3504_p13), %s4450_s24, 2048, %s4456_s13, %s2076_s19, %s3341_s5, %s3341_s5, %s3342_s7  }
 0x348   : > { %s2081_s22 = scalar_lea.sflag [#allocation12], %s3541_s8  ;;  %s3222_s16 = scalar_lea.vmem %s4463_s26, 2048 }
 0x349   : > { %p3223_p6 = scmp.ne.s32.totalorder %s4463_s26, %s3222_s16  ;;  %s3343_s1 = smov [#allocation11]  }
 0x34a   : > { %s3226_s3 = sshll.u32 %s3343_s1, 4  ;;  %s3227_s3 = int_to_ptr.vmem [resolvable:$false] %s3226_s3 }
 0x34b   : > { %p3224_p3 = pnand %p3223_p6, %p3504_p13  ;;  %s3228_s14 = scalar_lea.vmem %s3227_s3, 4096 }
 0x34c   : > { %p3229_p4 = scmp.lt.s32.totalorder %s4463_s26, %s3227_s3  ;;  %p3230_p2 = scmp.lt.s32.totalorder %s3228_s14, %s3222_s16 }
 0x34d   : > { %p3225_p5 = pneg %p3224_p3 }
 0x34e   : > { %p3231_p8 = por %p3230_p2, %p3229_p4 }
 0x350   : > { %p3232_p11 = pnand %p3231_p8, %p3225_p5 }
 0x352   : > { %3235 = shalt.err (!%p3232_p11)
}
 0x353   : > { %s3236_s24 = scalar_lea.hbm %s4461_s17, 2048  ;;  %s3240_s19 = scalar_lea.hbm %s4666_s15, 8192 }
 0x354   : > { %p3237_p7 = scmp.ne.s32.totalorder %s4461_s17, %s3236_s24  ;;  %p3241_p10 = scmp.lt.s32.totalorder %s4461_s17, %s4666_s15 }
 0x355   : > { %p3242_p0 = scmp.lt.s32.totalorder %s3240_s19, %s3236_s24 }
 0x356   : > { %p3238_p9 = pnand %p3237_p7, %p3504_p13 }
 0x357   : > { %p3243_p1 = por %p3242_p0, %p3241_p10 }
 0x358   : > { %p3239_p12 = pneg %p3238_p9 }
 0x35a   : > { %p3244_p6 = pnand %p3243_p1, %p3239_p12 }
 0x35c   : > { %3247 = shalt.err (!%p3244_p6)
}
 0x35d   : > { %2889 = dma.vmem_to_hbm [thread:$0]  (%p3504_p13), %s4463_s26, 2048, %s4461_s17, %s2081_s22, %s3341_s5, %s3341_s5, %s3342_s7  }
 0x35e PF: > { %s4667_s30 = sld [smem:[#allocation18_spill]]  ;;  %p2920_p3 = scmp.ge.s32.totalorder %s3330_s12, 2 }
 0x35f   : > { %s4668_s10 = sld [smem:[#allocation20_spill]] }
 0x364   : > { %s2129_s21 = sand.u32 1, %s4667_s30  }
 0x365   : > { %p4669_p5 = scmp.ne.s32.totalorder %s4668_s10, 0  ;;  %s2130_s16 = scalar_lea.sflag [#allocation4], %s2129_s21 }
 0x367   : > { %p2907_p4 = pnand %p2920_p3, %p4669_p5 }
 0x369   : > { %p2908_p2 = pneg %p2907_p4 }
 0x36b   : > { %3293 = dma.done.wait (%p2908_p2), %s2130_s16, 2048  }
 0x36c   : > { %3295 = vsyncadd (%p2908_p2), %s2130_s16, 4294965248  ;;  %s2139_s1 = scalar_lea.sflag [#allocation12], %s2129_s21 }
 0x36d   : > { %3297 = dma.done.wait (%p2908_p2), %s2139_s1, 2048  }
 0x36e   : > { %3299 = vsyncadd (%p2908_p2), %s2139_s1, 4294965248  ;;  %s30_s12 = sadd.s32 1, %s3330_s12   ;;  %s4670_s30 = sld [smem:[#allocation19_spill]] }
 0x36f   : > { %p27_p8 = scmp.ge.s32.totalorder %s30_s12, 6   ;;  %s4671_s10 = sld [smem:[#allocation21_spill]] }
 0x370   : > { %s4672_s27 = smov %s3306_s28  ;;  %s4673_s28 = smov %s3310_s29 }
 0x371   : > { %s4674_s29 = smov %s3521_s18  ;;  %s4675_s9 = smov %s3326_s11 }
 0x372   : > { %s4676_s11 = smov %s4682_s23  ;;  %29 = sbr.rel (!%p27_p8) target bundleno = 17 (0x11), region = 122 }
 0x377   :  { %2144 = vsyncpa [#allocation3], 1 }
 0x378   :  { %2146 = vsyncpa [#allocation3 + $0x1], 1 }
 0x379   :  { %2147 = vsyncpa [#allocation6], 1 }
 0x37a   :  { %2148 = vsyncpa [#allocation9], 1 }
 0x37b   :  { %2149 = vsyncpa [#allocation4], 1 }
 0x37c   :  { %2151 = vsyncpa [#allocation4 + $0x1], 1 }
 0x37d   :  { %2152 = vsyncpa [#allocation12], 1 }
 0x37e   :  { %2154 = vsyncpa [#allocation12 + $0x1], 1 }

</bundles_post_ra>
